<compile_context>
chip_gen: v7x
topology: tpu7x:2x2x1
jax: 0.10.0
libtpu: 0.0.40
codegen_flags: <defaults>
</compile_context>

<pallas_src>
import functools

import jax
import jax.numpy as jnp
from jax import lax
from jax.experimental import pallas as pl
from jax.experimental.pallas import tpu as pltpu

_MiB = 1024 * 1024


# ---------------------------------------------------------------------------
# Kernel
# ---------------------------------------------------------------------------
def _rm_bg_kernel(csm_ref, img_ref, out_ref, *, k):
    """csm_ref: (C, R, L); img_ref / out_ref: (R, L*k)."""
    C = csm_ref.shape[0]

    # Streamed coil-magnitude accumulation: one |csm| plane + one accumulator
    # live at a time.  Fully unrolled for small static C (LLO visibility).
    rcsm = jnp.abs(csm_ref[0])
    if C <= 32:
        for c in range(1, C):                       # static full unroll
            rcsm = rcsm + jnp.abs(csm_ref[c])
    else:
        rcsm = lax.fori_loop(1, C, lambda c, a: a + jnp.abs(csm_ref[c]),
                             rcsm, unroll=True)

    mask = (rcsm > 0.0).astype(out_ref.dtype)       # (R, L), values in {0, 1}

    # Lane interleave: mask_k[:, j] = mask[:, j // k].  VMEM-local VALU/XLU
    # work, hidden under the HBM-bound DMA stream.
    mask_k = mask if k == 1 else jnp.repeat(mask, k, axis=-1)

    # NOTE: if a profile ever shows the csm DMA exposed, add
    # pipeline_mode=pl.Buffered(3) on the csm BlockSpec only (and account for
    # 3x buffering of csm in _pick_tile_rows).
    out_ref[...] = mask_k * img_ref[...]


# ---------------------------------------------------------------------------
# Device / tiling helpers
# ---------------------------------------------------------------------------
def _tpu_info():
    """(vmem_capacity_bytes, tensorcores_per_chip) with safe fallbacks."""
    vmem = 64 * _MiB
    try:
        vmem = int(pltpu.get_tpu_info().vmem_capacity_bytes)
    except Exception:
        pass
    if vmem < 16 * _MiB:
        vmem = 64 * _MiB
    # Generation gate using only the documented field: 64 MiB-per-TC parts
    # (v7x) have 2 TensorCores per chip; 128 MiB parts (v5e / v6e) have 1.
    cores = 2 if vmem <= 64 * _MiB else 1
    return vmem, cores


def _sublane_multiple(dtype):
    # f32 -> 8, bf16 -> 16, int8/fp8 -> 32 (sub-32-bit dtypes pack sublanes).
    return max(8, 32 // max(1, jnp.dtype(dtype).itemsize))


def _pick_tile_rows(rows, lanes, C, K, img_itemsize, csm_itemsize,
                    sub_mult, budget, min_row_tiles):
    """Largest row tile (multiple of sub_mult dividing rows, or full rows)
    whose double-buffered blocks + in-kernel temporaries fit `budget`,
    preferring >= min_row_tiles row tiles so multi-TC chips stay fed."""
    bytes_per_row = (
        2 * csm_itemsize * C * lanes          # csm block, double-buffered
        + 4 * img_itemsize * lanes * K        # img + out blocks, double-buffered
        + 4 * lanes * (1 + K)                 # rcsm/mask + mask_k f32 temporaries
    )
    cands = [d for d in range(sub_mult, rows + 1, sub_mult) if rows % d == 0]
    if rows not in cands:
        cands.append(rows)                    # full-extent block is always legal
    feasible = [d for d in cands if d * bytes_per_row <= budget] or [min(cands)]
    preferred = [d for d in feasible if rows // d >= min_row_tiles]
    return max(preferred) if preferred else max(feasible)


# ---------------------------------------------------------------------------
# Wrapper
# ---------------------------------------------------------------------------
def rm_bg(img, csm, *, tile_rows=None):
    """img: (B, H, W, K) float; csm: (B, C, H, W) float -> (B, H, W, K).

    Zeroes img wherever sum_c |csm| == 0 (background), matching PyTorch rm_bg.
    csm is treated as real float (elementwise abs), exactly like the module.
    """
    B, H, W, K = img.shape
    Bc, C, Hc, Wc = csm.shape
    assert (B, H, W) == (Bc, Hc, Wc), "img / csm spatial shapes disagree"

    S = H * W
    sub_mult = max(_sublane_multiple(img.dtype), _sublane_multiple(csm.dtype))

    vmem_cap, num_cores = _tpu_info()
    vmem_limit = int(min(vmem_cap // 2, 96 * _MiB))
    if vmem_cap >= 96 * _MiB:
        block_budget = int(0.7 * vmem_limit)   # 128 MiB parts (v5e/v6e): ~45 MiB
    else:
        block_budget = vmem_cap // 4           # 64 MiB v7x parts: 16 MiB
    min_row_tiles = 1 if B >= num_cores else -(-num_cores // B)

    # Free contiguous views only (no transposes, single HBM pass).
    if S % 128 == 0:
        lanes = 128           # lane-dense path: spatial flattened to (rows, 128)
        rows = S // lanes
    else:
        lanes = W             # fallback: tile over H, full-W blocks
        rows = H
    csm_v = csm.reshape(B, C, rows, lanes)
    img_v = img.reshape(B, rows, lanes * K)

    if tile_rows is None:
        tile_rows = _pick_tile_rows(rows, lanes, C, K,
                                    img.dtype.itemsize, csm.dtype.itemsize,
                                    sub_mult, block_budget, min_row_tiles)
    assert rows % tile_rows == 0 and (tile_rows % sub_mult == 0 or tile_rows == rows), (
        f"tile_rows={tile_rows} must divide rows={rows} and be a multiple of "
        f"{sub_mult} (or equal rows)")
    n_r = rows // tile_rows

    out_v = pl.pallas_call(
        functools.partial(_rm_bg_kernel, k=K),
        out_shape=jax.ShapeDtypeStruct((B, rows, lanes * K), img.dtype),
        grid=(B, n_r),
        in_specs=[
            # csm: batch squeezed, all coils, one row tile, full lane extent.
            pl.BlockSpec((None, C, tile_rows, lanes), lambda b, r: (b, 0, r, 0)),
            # img (reshaped): batch squeezed, one row tile, lane-dense lanes*K.
            pl.BlockSpec((None, tile_rows, lanes * K), lambda b, r: (b, r, 0)),
        ],
        out_specs=pl.BlockSpec((None, tile_rows, lanes * K), lambda b, r: (b, r, 0)),
        compiler_params=pltpu.CompilerParams(
            dimension_semantics=("parallel", "parallel"),
            vmem_limit_bytes=vmem_limit,
        ),
        # NOTE: callers that can donate img may add input_output_aliases={1: 0}
        # to reuse img's HBM allocation for the output (halves HBM footprint).
    )(csm_v, img_v)

    return out_v.reshape(B, H, W, K)


# ---------------------------------------------------------------------------
# Reference + self-test
# ---------------------------------------------------------------------------
def rm_bg_reference(img, csm):
    rcsm = jnp.sum(jnp.abs(csm), axis=1, keepdims=True)       # (B, 1, H, W)
    cmask = (rcsm > 0).astype(img.dtype)[:, 0][..., None]     # (B, H, W, 1)
    return cmask * img


def _make_inputs(key, B, C, H, W, K):
    k_img, k_csm, k_bg = jax.random.split(key, 3)
    img = jax.random.normal(k_img, (B, H, W, K), dtype=jnp.float32)
    csm = jax.random.normal(k_csm, (B, C, H, W), dtype=jnp.float32)
    # Zero a background region across all coils so the mask is nontrivial.
    bg = (jax.random.uniform(k_bg, (B, 1, H, W)) > 0.5).astype(jnp.float32)
    return img, csm * bg


if __name__ == "__main__":
    key = jax.random.PRNGKey(0)
    k1, k2, k3 = jax.random.split(key, 3)

    def check(img, csm, **kw):
        out = jax.block_until_ready(rm_bg(img, csm, **kw))
        ref = rm_bg_reference(img, csm)
        assert out.shape == img.shape
        assert jnp.allclose(out, ref, atol=1e-6), "mismatch vs reference"

    # Module-implied shapes: img (2, 16, 16, 2), csm (2, 4, 16, 16)
    # -> lane-dense flat path (H*W = 256, lanes = 128).
    img, csm = _make_inputs(k1, B=2, C=4, H=16, W=16, K=2)
    check(img, csm)

    # Larger shape, B=1: row axis supplies the parallel grid points on v7x,
    # coil reduction unrolled over 8 coils, multi-row tiles.
    img2, csm2 = _make_inputs(k2, B=1, C=8, H=64, W=64, K=2)
    check(img2, csm2)

    # Fallback path: H*W not divisible by 128 (full-W blocks), K=1.
    img3, csm3 = _make_inputs(k3, B=2, C=3, H=8, W=24, K=1)
    check(img3, csm3)

    print("KERNEL_OK")
</pallas_src>

<mosaic_0001>
module attributes {stable_mosaic.version = 11 : i64} {
  func.func @_rm_bg_kernel(%arg0: i32, %arg1: i32, %arg2: memref<1x4x2x128xf32, #tpu.memory_space<vmem>>, %arg3: memref<1x2x256xf32, #tpu.memory_space<vmem>>, %arg4: memref<1x2x256xf32, #tpu.memory_space<vmem>>) attributes {dimension_semantics = [#tpu.dimension_semantics<parallel>, #tpu.dimension_semantics<parallel>], iteration_bounds = array<i64: 2, 1>, scalar_prefetch = 0 : i64, scratch_operands = 0 : i64, tpu.core_type = #tpu.core_type<tc>, window_params = [{transform_indices = @transform_0, window_bounds = array<i64: 1, 4, 2, 128>}, {transform_indices = @transform_1, window_bounds = array<i64: 1, 2, 256>}, {transform_indices = @transform_2, window_bounds = array<i64: 1, 2, 256>}]} {
    %c0 = arith.constant 0 : index
    %c0_0 = arith.constant 0 : index
    %c0_1 = arith.constant 0 : index
    %c0_2 = arith.constant 0 : index
    %0 = vector.load %arg2[%c0, %c0_0, %c0_1, %c0_2] : memref<1x4x2x128xf32, #tpu.memory_space<vmem>>, vector<1x1x2x128xf32>
    %1 = vector.shape_cast %0 : vector<1x1x2x128xf32> to vector<2x128xf32>
    %2 = math.absf %1 : vector<2x128xf32>
    %c0_3 = arith.constant 0 : index
    %c1 = arith.constant 1 : index
    %c0_4 = arith.constant 0 : index
    %c0_5 = arith.constant 0 : index
    %3 = vector.load %arg2[%c0_3, %c1, %c0_4, %c0_5] : memref<1x4x2x128xf32, #tpu.memory_space<vmem>>, vector<1x1x2x128xf32>
    %4 = vector.shape_cast %3 : vector<1x1x2x128xf32> to vector<2x128xf32>
    %5 = math.absf %4 : vector<2x128xf32>
    %6 = arith.addf %2, %5 : vector<2x128xf32>
    %c0_6 = arith.constant 0 : index
    %c2 = arith.constant 2 : index
    %c0_7 = arith.constant 0 : index
    %c0_8 = arith.constant 0 : index
    %7 = vector.load %arg2[%c0_6, %c2, %c0_7, %c0_8] : memref<1x4x2x128xf32, #tpu.memory_space<vmem>>, vector<1x1x2x128xf32>
    %8 = vector.shape_cast %7 : vector<1x1x2x128xf32> to vector<2x128xf32>
    %9 = math.absf %8 : vector<2x128xf32>
    %10 = arith.addf %6, %9 : vector<2x128xf32>
    %c0_9 = arith.constant 0 : index
    %c3 = arith.constant 3 : index
    %c0_10 = arith.constant 0 : index
    %c0_11 = arith.constant 0 : index
    %11 = vector.load %arg2[%c0_9, %c3, %c0_10, %c0_11] : memref<1x4x2x128xf32, #tpu.memory_space<vmem>>, vector<1x1x2x128xf32>
    %12 = vector.shape_cast %11 : vector<1x1x2x128xf32> to vector<2x128xf32>
    %13 = math.absf %12 : vector<2x128xf32>
    %14 = arith.addf %10, %13 : vector<2x128xf32>
    %cst = arith.constant 0.000000e+00 : f32
    %15 = vector.broadcast %cst : f32 to vector<2x128xf32>
    %16 = arith.cmpf ogt, %14, %15 : vector<2x128xf32>
    %17 = arith.extui %16 : vector<2x128xi1> to vector<2x128xi32>
    %18 = arith.sitofp %17 : vector<2x128xi32> to vector<2x128xf32>
    %19 = vector.shape_cast %18 : vector<2x128xf32> to vector<2x128x1xf32>
    %20 = vector.broadcast %19 : vector<2x128x1xf32> to vector<2x128x2xf32>
    %21 = vector.shape_cast %20 : vector<2x128x2xf32> to vector<2x256xf32>
    %c0_12 = arith.constant 0 : index
    %c0_13 = arith.constant 0 : index
    %c0_14 = arith.constant 0 : index
    %22 = vector.load %arg3[%c0_12, %c0_13, %c0_14] : memref<1x2x256xf32, #tpu.memory_space<vmem>>, vector<1x2x256xf32>
    %23 = vector.shape_cast %22 : vector<1x2x256xf32> to vector<2x256xf32>
    %24 = arith.mulf %21, %23 : vector<2x256xf32>
    %c0_15 = arith.constant 0 : index
    %c0_16 = arith.constant 0 : index
    %c0_17 = arith.constant 0 : index
    %25 = vector.load %arg4[%c0_15, %c0_16, %c0_17] : memref<1x2x256xf32, #tpu.memory_space<vmem>>, vector<1x2x256xf32>
    %26 = vector.shape_cast %25 : vector<1x2x256xf32> to vector<2x256xf32>
    %27 = vector.shape_cast %24 : vector<2x256xf32> to vector<1x2x256xf32>
    tpu.vector_store %arg4[%c0_15, %c0_16, %c0_17], %27 {strides = array<i32>} : memref<1x2x256xf32, #tpu.memory_space<vmem>>, vector<1x2x256xf32>,
    return
  }
  func.func @transform_0(%arg0: i32, %arg1: i32) -> (i32, i32, i32, i32) {
    %c0_i32 = arith.constant 0 : i32
    %c0_i32_0 = arith.constant 0 : i32
    %c0_i32_1 = arith.constant 0 : i32
    return %arg0, %c0_i32, %arg1, %c0_i32_0 : i32, i32, i32, i32
  }
  func.func @transform_1(%arg0: i32, %arg1: i32) -> (i32, i32, i32) {
    %c0_i32 = arith.constant 0 : i32
    %c0_i32_0 = arith.constant 0 : i32
    return %arg0, %arg1, %c0_i32 : i32, i32, i32
  }
  func.func @transform_2(%arg0: i32, %arg1: i32) -> (i32, i32, i32) {
    %c0_i32 = arith.constant 0 : i32
    %c0_i32_0 = arith.constant 0 : i32
    return %arg0, %arg1, %c0_i32 : i32, i32, i32
  }
}

</mosaic_0001>

<bundles_post_ra>
// kernel: tpu_custom_call.1
= control target key start
LH: loop header
LB: loop body
LE: loop exit
PB: predicated region body
PF: predicated region fallthrough
CT: control target
= control target key end

     0   :  { %7 = vsyncpa [#allocation3], 0  ;;  %s3577_s0 = inlined_call_operand.hbm [shape: f32[2,4,2,128], index: 0, kind: input, shape index: {}]   ;;  %s3578_s1 = inlined_call_operand.hbm [shape: f32[2,2,256], index: 1, kind: input, shape index: {}]   ;;  %s3579_s2 = inlined_call_operand.hbm [shape: f32[2,2,256], index: 2, kind: output, shape index: {}]  }
   0x1   :  { %9 = vsyncpa [#allocation3 + $0x1], 0 }
   0x2   :  { %10 = vsyncpa [#allocation6], 0 }
   0x3   :  { %12 = vsyncpa [#allocation6 + $0x1], 0 }
   0x4   :  { %13 = vsyncpa [#allocation4], 0 }
   0x5   :  { %15 = vsyncpa [#allocation4 + $0x1], 0  ;;  %s2670_s9 = smov 0   ;;  %s2672_s10 = smov 0  }
   0x6   :  { %s2674_s11 = smov 0   ;;  %s2676_s12 = smov 0  }
   0x7   :  { %s2678_s13 = smov 0   ;;  %s2680_s14 = smov 0  }
   0x8 LB: > { %s2273_s15 = sadd.s32 4294967295, %s2582_s14   ;;  %s2274_s16 = sadd.s32 4294967294, %s2582_s14   ;;  %s2582_s14 = sphi %s2680_s14, %s21_s14   ;;  %s2578_s13 = sphi %s2678_s13, %s3788_s13   ;;  %s2574_s12 = sphi %s2676_s12, %s3787_s12   ;;  %s2570_s11 = sphi %s2674_s11, %s3786_s11   ;;  %s2566_s10 = sphi %s2672_s10, %s3785_s10   ;;  %s2562_s9 = sphi %s2670_s9, %s3784_s9  }
   0x9   : > { %s33_s17 = sadd.s32 1, %s2578_s13  ;;  %s42_s18 = sadd.s32 1, %s2570_s11 }
   0xa   : > { %p35_p0 = scmp.ge.s32.totalorder %s33_s17, 2  ;;  %p49_p1 = scmp.ne.s32.totalorder %s2570_s11, %s2566_s10 }
   0xb   : > { %p50_p2 = scmp.eq.s32.totalorder %s2582_s14, 0  ;;  %p55_p3 = scmp.ne.s32.totalorder %s2566_s10, %s2562_s9 }
   0xc   : > { %s3790_s17 = smov (%p35_p0, %s33_s17), 0  ;;  %p56_p5 = scmp.eq.s32.totalorder %s2273_s15, 0 }
   0xd   : > { %p2711_p4 = por %p50_p2, %p49_p1  ;;  %s37_s20 = ssub.s32 %s2578_s13, %s3790_s17 }
   0xe   : > { %p109_p6 = scmp.eq.s32.totalorder %s2273_s15, 1  ;;  %p40_p7 = scmp.eq.s32.totalorder %s37_s20, 0 }
   0xf   : > { %p2717_p8 = por %p56_p5, %p55_p3  ;;  %p115_p10 = scmp.eq.s32.totalorder %s2274_s16, 1 }
  0x10   : > { %p2721_p9 = por %p109_p6, %p49_p1  ;;  %p2318_p13 = scmp.lt.s32.totalorder %s2582_s14, 2 }
  0x11   : > { %s3678_s21 = scalar_select %p2717_p8, 1, 0 }
  0x12   : > { %s3679_s22 = scalar_select %p2721_p9, 1, 0 }
  0x13   : > { %s2726_s23 = scalar_select %p40_p7, %s2570_s11, %s42_s18  }
  0x14   : > { %p2728_p11 = por %p115_p10, %p55_p3  ;;  %s2735_s25 = sand.u32 1, %s2570_s11  }
  0x15   : > { %s2277_s26 = sshll.u32 %s2735_s25, 3  ;;  %s2298_s27 = sshll.u32 %s2578_s13, 7 }
  0x16   : > { %s3680_s24 = scalar_select %p2728_p11, 1, 0 }
  0x17   : > { %s2742_s30 = scalar_lea.hbm %s3577_s0, %s2298_s27  ;;  %s139_s3 = scalar_lea.vmem [#allocation2], %s2277_s26 }
  0x18   : > { %s147_s4 = sshll.u32 %s139_s3, 4  ;;  %p2748_p0 = pnand %p2318_p13, %p2711_p4  ;;  %s2744_s4 = int_to_ptr.vmem [resolvable:$true] %s147_s4 }
  0x19   : > { %s136_s6 = scalar_lea.sflag [#allocation3], %s2735_s25  ;;  %s2436_s7 = scalar_lea.hbm %s2742_s30, 128 }
  0x1a   : > { %p2437_p2 = scmp.ne.s32.totalorder %s2742_s30, %s2436_s7  ;;  %p2438_p3 = pneg %p2748_p0 }
  0x1b   : > { %s2441_s16 = scalar_lea.hbm %s3577_s0, 256  ;;  %p2442_p4 = scmp.lt.u32.totalorder %s2742_s30, %s3577_s0 }
  0x1c   : > { %p2439_p5 = pnand %p2438_p3, %p2437_p2  ;;  %p2443_p7 = scmp.lt.u32.totalorder %s2441_s16, %s2436_s7 }
  0x1d   : > { %p2445_p13 = scmp.lt.u32.totalorder %s2436_s7, %s2742_s30 }
  0x1e   : > { %p2440_p6 = pneg %p2439_p5  ;;  %p2444_p10 = por %p2443_p7, %p2442_p4 }
  0x20   : > { %p2446_p12 = por %p2445_p13, %p2444_p10 }
  0x22   : > { %p2447_p1 = pnand %p2446_p12, %p2440_p6 }
  0x24   : > { %2450 = shalt.err (!%p2447_p1)
}
  0x25   : > { %s2451_s20 = scalar_lea.vmem %s2744_s4, 128  ;;  %s2584_s26 = smov [#allocation2]  }
  0x26   : > { %p2452_p2 = scmp.ne.s32.totalorder %s2744_s4, %s2451_s20  ;;  %s2456_s27 = sshll.u32 %s2584_s26, 4  ;;  %s2457_s27 = int_to_ptr.vmem [resolvable:$false] %s2456_s27 }
  0x27   : > { %s2458_s28 = scalar_lea.vmem %s2457_s27, 256  ;;  %p2459_p9 = scmp.lt.s32.totalorder %s2744_s4, %s2457_s27 }
  0x28   : > { %p2454_p5 = pnand %p2452_p2, %p2438_p3  ;;  %p2460_p4 = scmp.lt.s32.totalorder %s2458_s28, %s2451_s20 }
  0x2a   : > { %p2455_p11 = pneg %p2454_p5  ;;  %p2461_p7 = por %p2460_p4, %p2459_p9 }
  0x2c   : > { %p2462_p10 = pnand %p2461_p7, %p2455_p11 }
  0x2e   : > { %2465 = shalt.err (!%p2462_p10)
}
  0x2f   : > { %s2585_s29 = smov 32   ;;  %s2586_s3 = smov 2  }
  0x30   : > { %2310 = dma.hbm_to_vmem [thread:$0]  (!%p2748_p0), %s2742_s30, 128, %s2744_s4, %s136_s6, %s2585_s29, %s2585_s29, %s2586_s3  }
  0x31   : > { %p176_p12 = scmp.lt.s32.totalorder %s2582_s14, 3  ;;  %s2280_s7 = sshll.u32 %s2735_s25, 2 }
  0x32   : > { %s2299_s8 = sshll.u32 %s2578_s13, 6  ;;  %p3682_p9 = scmp.ge.s32.totalorder %s2582_s14, 1 }
  0x33   : > { %s2793_s19 = scalar_lea.hbm %s3578_s1, %s2299_s8  ;;  %s161_s20 = scalar_lea.vmem [#allocation5], %s2280_s7 }
  0x34   : > { %p2786_p11 = pnand %p3682_p9, %p176_p12  ;;  %s171_s26 = sshll.u32 %s161_s20, 4  ;;  %s172_s26 = int_to_ptr.vmem [resolvable:$true] %s171_s26 }
  0x35   : > { %s158_s30 = scalar_lea.sflag [#allocation6], %s2735_s25  ;;  %s2466_s4 = scalar_lea.hbm %s2793_s19, 64 }
  0x36   : > { %s3683_s15 = scalar_select %p2786_p11, 1, 0 }
  0x37   : > { %p2467_p1 = scmp.ne.s32.totalorder %s2793_s19, %s2466_s4  ;;  %s2471_s28 = scalar_lea.hbm %s3578_s1, 128 }
  0x38   : > { %p2472_p2 = scmp.lt.u32.totalorder %s2793_s19, %s3578_s1  ;;  %p2473_p5 = scmp.lt.u32.totalorder %s2471_s28, %s2466_s4 }
  0x39   : > { %p2469_p6 = pnand %p2467_p1, %p2438_p3  ;;  %p2475_p7 = scmp.lt.u32.totalorder %s2466_s4, %s2793_s19 }
  0x3a   : > { %p2474_p4 = por %p2473_p5, %p2472_p2 }
  0x3b   : > { %p2470_p13 = pneg %p2469_p6 }
  0x3c   : > { %p2476_p10 = por %p2475_p7, %p2474_p4 }
  0x3e   : > { %p2477_p12 = pnand %p2476_p10, %p2470_p13 }
  0x40   : > { %2480 = shalt.err (!%p2477_p12)
}
  0x41   : > { %s2481_s25 = scalar_lea.vmem %s172_s26, 64  ;;  %s2587_s7 = smov [#allocation5]  }
  0x42   : > { %p2482_p9 = scmp.ne.s32.totalorder %s172_s26, %s2481_s25  ;;  %s2486_s8 = sshll.u32 %s2587_s7, 4  ;;  %s2487_s8 = int_to_ptr.vmem [resolvable:$false] %s2486_s8 }
  0x43   : > { %s2488_s16 = scalar_lea.vmem %s2487_s8, 128  ;;  %p2489_p8 = scmp.lt.s32.totalorder %s172_s26, %s2487_s8 }
  0x44   : > { %p2484_p1 = pnand %p2482_p9, %p2438_p3  ;;  %p2490_p11 = scmp.lt.s32.totalorder %s2488_s16, %s2481_s25 }
  0x46   : > { %p2485_p6 = pneg %p2484_p1  ;;  %p2491_p2 = por %p2490_p11, %p2489_p8 }
  0x48   : > { %p2492_p5 = pnand %p2491_p2, %p2485_p6 }
  0x4a   : > { %2495 = shalt.err (!%p2492_p5)
}
  0x4b   : > { %2313 = dma.hbm_to_vmem [thread:$0]  (!%p2748_p0), %s2793_s19, 64, %s172_s26, %s158_s30  }
  0x4c   : > { %p3684_p13 = scmp.ne.s32.totalorder %s3683_s15, 0 }
  0x4d   : > { %s2818_s18 = sand.u32 (!%p3684_p13), 1, %s2566_s10   ;;  %p3685_p3 = scmp.ne.s32.totalorder (!%p3684_p13), %s3678_s21, 0 }
  0x4e   : > { %180 = sbr.rel (%p3684_p13) target bundleno = 640 (0x280), region = 28  ;;  %s2284_s20 = sshll.u32 (!%p3684_p13), %s2818_s18, 3 }
  0x4f   : > { %s183_s4 = scalar_lea.sflag (!%p3684_p13), [#allocation3], %s2818_s18  ;;  %s186_s6 = scalar_lea.vmem (!%p3684_p13), [#allocation2], %s2284_s20 }
  0x55   : > { %2549 = dma.done.wait (%p3685_p3), %s183_s4, 128  }
  0x56   : > { %2551 = vsyncadd (%p3685_p3), %s183_s4, 4294967168  ;;  %s3582_s5 = sshll.u32 %s2818_s18, 2  ;;  %s192_s15 = scalar_lea.sflag [#allocation6], %s2818_s18 }
  0x57   : > { %s2830_s19 = scalar_lea.vmem [#allocation5], %s3582_s5 }
  0x58   : > { %2553 = dma.done.wait (%p3685_p3), %s192_s15, 64  }
  0x59   : > { %2555 = vsyncadd (%p3685_p3), %s192_s15, 4294967232  ;;  %v238_v0 = vlaneseq  ;;  %v221_v1 = vld [vmem:[%s186_s6] sm:$0x3]  ;;  %v2287_v2 = vld [vmem:[%s186_s6 + $0x2] sm:$0x3]  ;;  %v2588_v14 = vmov 0.0  }
  0x5a   : > { %v2288_v3 = vld [vmem:[%s186_s6 + $0x4] sm:$0x3]  ;;  %v222_v4 = vand.u32 2147483647, %v221_v1  ;;  %v225_v5 = vand.u32 2147483647, %v2287_v2 }
  0x5b   : > { %v229_v6 = vand.u32 2147483647, %v2288_v3  ;;  %v2289_v7 = vld [vmem:[%s186_s6 + $0x6] sm:$0x3]  ;;  %v2836_v10 = vshrl.u32 %v238_v0, 7  ;;  %s2591_s21 = smov 4  }
  0x5c   : > { %v226_v8 = vadd.f32 %v225_v5, %v222_v4  ;;  %v233_v9 = vand.u32 2147483647, %v2289_v7  ;;  %v2589_v31 = vmov 1983009808   ;;  %v2590_v36 = vmov 1934713408  }
  0x5d   : > { %v240_v13 = vsub.s32 0, %v2836_v10  ;;  %v307_v17 = vsub.s32 1, %v2836_v10  ;;  %v374_v32 = vunpack.c.l.s4 %v2589_v31  ;;  %v405_v37 = vunpack.c.l.s4 %v2590_v36  ;;  %s2592_s26 = smov 2   ;;  %s2593_s30 = smov 16  }
  0x5e   : > { %v230_v11 = vadd.f32 %v229_v6, %v226_v8  ;;  %s2594_s27 = smov 6   ;;  %s2595_s28 = smov 20   ;;  %vm1932_vm1 = vcmask 15360   ;;  %vm1934_vm2 = vcmask 31744   ;;  %vm1936_vm3 = vcmask 48128  }
  0x5f   : > { %v375_v35 = vunpack.c.0.s8 %v374_v32  ;;  %v406_v41 = vunpack.c.0.s8 %v405_v37  ;;  %s2596_s29 = smov 18   ;;  %s3595_s3 = smov 32   ;;  %vm1938_vm4 = vcmask 64512   ;;  %vm1940_vm5 = vcmask 80896  }
  0x60   : > { %v234_v12 = vadd.f32 %v233_v9, %v230_v11  ;;  %s2598_s25 = smov 22   ;;  %s3593_s7 = smov 36   ;;  %vm1942_vm6 = vcmask 97280   ;;  %vm1944_vm7 = vcmask 113664   ;;  %vm1946_vm8 = vcmask 130048  }
  0x61   : > { %v2874_v40 = vsub.s32 %v375_v35, %v2836_v10  ;;  %v2883_v45 = vsub.s32 %v406_v41, %v2836_v10  ;;  %s3596_s8 = smov 34   ;;  %s3590_s16 = smov 48   ;;  %vm1948_vm9 = vcmask 146432   ;;  %vm3630_vm10 = vcmask 162816  }
  0x62   : > { %vm235_vm0 = vcmp.gt.f32.partialorder %v234_v12, 0.0  ;;  %s3594_s20 = smov 38   ;;  %s3583_s4 = smov 52   ;;  %vm3646_vm11 = vcmask 179200   ;;  %vm3631_vm12 = vcmask 195584   ;;  %vm3632_vm13 = vcmask 211968  }
  0x63   : > { %v2290_v15 = vsel %vm235_vm0, 1.0, %v2588_v14  ;;  %s3592_s6 = smov 50   ;;  %s3584_s15 = smov 64   ;;  %vm3633_vm14 = vcmask 228352   ;;  %vm3635_vm15 = vcmask 244736   ;;  %vm3634_vm0 = vcmask 261120  }
  0x64   : > { %v241_v16 = vrot.slane %v2290_v15, %v240_v13  ;;  %v308_v18 = vrot.slane %v2290_v15, %v307_v17  ;;  %s3585_s5 = smov 54   ;;  %p3781_p0 = scmp.ne.s32.totalorder %s3679_s22, 0 }
  0x66   : > { %251 = vbcast.lane.b32.xlu1 %v241_v16, 272  ;;  %243 = vbcast.lane.b32.xlu0 %v241_v16, 256 }
  0x6a   : > { %255 = vbcast.lane.b32.xlu1 %v241_v16, 280  ;;  %247 = vbcast.lane.b32.xlu0 %v241_v16, 264 }
  0x6e   : > { %263 = vbcast.lane.b32.xlu1 %v241_v16, 296  ;;  %259 = vbcast.lane.b32.xlu0 %v241_v16, 288 }
  0x72   : > { %271 = vbcast.lane.b32.xlu1 %v241_v16, 312  ;;  %267 = vbcast.lane.b32.xlu0 %v241_v16, 304 }
  0x76   : > { %279 = vbcast.lane.b32.xlu1 %v241_v16, 328  ;;  %275 = vbcast.lane.b32.xlu0 %v241_v16, 320 }
  0x7a   : > { %287 = vbcast.lane.b32.xlu1 %v241_v16, 344  ;;  %283 = vbcast.lane.b32.xlu0 %v241_v16, 336 }
  0x7e   : > { %295 = vbcast.lane.b32.xlu1 %v241_v16, 360  ;;  %291 = vbcast.lane.b32.xlu0 %v241_v16, 352 }
  0x82   : > { %303 = vbcast.lane.b32.xlu1 %v241_v16, 376  ;;  %299 = vbcast.lane.b32.xlu0 %v241_v16, 368 }
  0x86   : > { %314 = vbcast.lane.b32.xlu1 %v308_v18, 264  ;;  %310 = vbcast.lane.b32.xlu0 %v308_v18, 256 }
  0x8a   : > { %322 = vbcast.lane.b32.xlu1 %v308_v18, 280  ;;  %318 = vbcast.lane.b32.xlu0 %v308_v18, 272 }
  0x8e   : > { %330 = vbcast.lane.b32.xlu1 %v308_v18, 296  ;;  %326 = vbcast.lane.b32.xlu0 %v308_v18, 288 }
  0x92   : > { %338 = vbcast.lane.b32.xlu1 %v308_v18, 312  ;;  %334 = vbcast.lane.b32.xlu0 %v308_v18, 304 }
  0x96   : > { %346 = vbcast.lane.b32.xlu1 %v308_v18, 328  ;;  %342 = vbcast.lane.b32.xlu0 %v308_v18, 320 }
  0x9a   : > { %354 = vbcast.lane.b32.xlu1 %v308_v18, 344  ;;  %350 = vbcast.lane.b32.xlu0 %v308_v18, 336 }
  0x9e   : > { %362 = vbcast.lane.b32.xlu1 %v308_v18, 360  ;;  %358 = vbcast.lane.b32.xlu0 %v308_v18, 352 }
  0xa2   : > { %370 = vbcast.lane.b32.xlu1 %v308_v18, 376  ;;  %366 = vbcast.lane.b32.xlu0 %v308_v18, 368 }
  0xd8   : > { %v2841_v19 = vpop.permute.xlu1 %251  ;;  %v2843_v20 = vpop.permute.xlu0 %243 }
  0xd9   : > { %v379_v46 = vrot.slane %v2843_v20, %v2874_v40  ;;  %v511_v59 = vrot.slane %v2841_v19, %v2874_v40  ;;  %v372_v41 = vcombine.high %v2843_v20, %v2588_v14 }
  0xdb   : > { %v386_v20 = vrot.slane %v372_v41, %v2874_v40 }
  0xdc   : > { %v2845_v21 = vpop.permute.xlu1 %255  ;;  %v2847_v22 = vpop.permute.xlu0 %247 }
  0xdd   : > { %v445_v48 = vrot.slane %v2847_v22, %v2874_v40  ;;  %v577_v4 = vrot.slane %v2845_v21, %v2874_v40 }
  0xe0   : > { %v2849_v23 = vpop.permute.xlu1 %263  ;;  %v2851_v24 = vpop.permute.xlu0 %259 }
  0xe1   : > { %v643_v13 = vrot.slane %v2851_v24, %v2874_v40 }
  0xe4   : > { %v2853_v25 = vpop.permute.xlu1 %271  ;;  %v2855_v26 = vpop.permute.xlu0 %267 }
  0xe8   : > { %v2857_v27 = vpop.permute.xlu1 %279  ;;  %v2859_v28 = vpop.permute.xlu0 %275 }
  0xec   : > { %v2861_v29 = vpop.permute.xlu1 %287  ;;  %v2863_v30 = vpop.permute.xlu0 %283 }
  0xf0   : > { %v2865_v33 = vpop.permute.xlu1 %295  ;;  %v2867_v34 = vpop.permute.xlu0 %291 }
  0xf4   : > { %v2869_v38 = vpop.permute.xlu1 %303  ;;  %v2871_v39 = vpop.permute.xlu0 %299 }
  0xf8   : > { %v2876_v42 = vpop.permute.xlu1 %314  ;;  %v2878_v43 = vpop.permute.xlu0 %310 }
  0xf9   : > { %v394_v44 = vrot.slane %v2878_v43, %v2874_v40  ;;  %v460_v47 = vrot.slane %v2876_v42, %v2874_v40  ;;  %v387_v32 = vcombine.high %v2878_v43, %v2588_v14 }
  0xfb   : > { %v402_v49 = vcombine.low %v379_v46, %v394_v44  ;;  %v403_v50 = vcombine.high %v379_v46, %v394_v44  ;;  %v468_v51 = vcombine.low %v445_v48, %v460_v47  ;;  %v469_v56 = vcombine.high %v445_v48, %v460_v47 }
  0xfc   : > { %v2895_v54 = vpop.permute.xlu0 %318  ;;  %v2910_v63 = vpop.permute.xlu1 %322  ;;  %v2954_v44 = vrot.slane %v2849_v23, %v2874_v40  ;;  %v401_v46 = vrot.slane %v387_v32, %v2874_v40 }
  0xfd   : > { %v417_v52 = vrot.slane %v403_v50, %v2883_v45  ;;  %v2893_v53 = vrot.slane %v402_v49, %v2883_v45  ;;  %v526_v57 = vrot.slane %v2895_v54, %v2874_v40  ;;  %v476_v58 = vrot.slane %v468_v51, %v2883_v45 }
  0xfe   : > { %v483_v62 = vrot.slane %v469_v56, %v2883_v45  ;;  %v592_v1 = vrot.slane %v2910_v63, %v2874_v40  ;;  %v453_v50 = vcombine.high %v2876_v42, %v2588_v14 }
  0xff   : > { %1433 = vrot.lane.b32.xlu1 %v417_v52, %s2591_s21  ;;  %v434_v55 = vcombine.high %v2893_v53, %v2588_v14  ;;  %v435_v60 = vcombine.high %v417_v52, %v2588_v14  ;;  %v534_v61 = vcombine.low %v511_v59, %v526_v57  ;;  %v500_v0 = vcombine.high %v476_v58, %v2588_v14 }
 0x100   : > { %v535_v2 = vcombine.high %v511_v59, %v526_v57  ;;  %v501_v5 = vcombine.high %v483_v62, %v2588_v14  ;;  %v600_v6 = vcombine.low %v577_v4, %v592_v1  ;;  %v2924_v8 = vpop.permute.xlu0 %326  ;;  %v601_v10 = vcombine.high %v577_v4, %v592_v1  ;;  %v2938_v18 = vpop.permute.xlu1 %330 }
 0x101   : > { %1429 = vrot.lane.b32.xlu0 %v434_v55, %s2592_s26  ;;  %v542_v3 = vrot.slane %v534_v61, %v2883_v45  ;;  %v658_v11 = vrot.slane %v2924_v8, %v2874_v40  ;;  %v2946_v35 = vrot.slane %v2938_v18, %v2874_v40  ;;  %v418_v52 = vcombine.low %v386_v20, %v401_v46 }
 0x102   : > { %v549_v7 = vrot.slane %v535_v2, %v2883_v45  ;;  %v608_v12 = vrot.slane %v600_v6, %v2883_v45  ;;  %v615_v17 = vrot.slane %v601_v10, %v2883_v45  ;;  %v438_v55 = vcombine.high %v2847_v22, %v2588_v14 }
 0x103   : > { %1457 = vrot.lane.b32.xlu1 %v476_v58, %s2593_s30  ;;  %v566_v9 = vcombine.high %v542_v3, %v2588_v14  ;;  %v666_v16 = vcombine.low %v643_v13, %v658_v11  ;;  %v667_v36 = vcombine.high %v643_v13, %v658_v11  ;;  %v732_v47 = vcombine.low %v2954_v44, %v2946_v35 }
 0x104   : > { %v567_v15 = vcombine.high %v549_v7, %v2588_v14  ;;  %v632_v31 = vcombine.high %v608_v12, %v2588_v14  ;;  %v633_v43 = vcombine.high %v615_v17, %v2588_v14  ;;  %v467_v57 = vrot.slane %v453_v50, %v2874_v40 }
 0x105   : > { %1437 = vrot.lane.b32.xlu0 %v435_v60, %s2594_s27  ;;  %v674_v37 = vrot.slane %v666_v16, %v2883_v45  ;;  %v681_v48 = vrot.slane %v667_v36, %v2883_v45  ;;  %v740_v51 = vrot.slane %v732_v47, %v2883_v45  ;;  %v426_v42 = vrot.slane %v418_v52, %v2883_v45 }
 0x106   : > { %v419_v58 = vcombine.high %v386_v20, %v401_v46  ;;  %v452_v59 = vrot.slane %v438_v55, %v2874_v40  ;;  %v519_v60 = vcombine.high %v2895_v54, %v2588_v14  ;;  %v702_v50 = vcombine.high %v2849_v23, %v2588_v14 }
 0x107   : > { %1465 = vrot.lane.b32.xlu1 %v483_v62, %s2595_s28  ;;  %v698_v49 = vcombine.high %v674_v37, %v2588_v14  ;;  %v699_v56 = vcombine.high %v681_v48, %v2588_v14  ;;  %v764_v22 = vcombine.high %v740_v51, %v2588_v14  ;;  %v436_v1 = vcombine.high %v426_v42, %v2588_v14 }
 0x108   : > { %v433_v61 = vrot.slane %v419_v58, %v2883_v45  ;;  %v484_v62 = vcombine.low %v452_v59, %v467_v57  ;;  %v533_v2 = vrot.slane %v519_v60, %v2874_v40  ;;  %v733_v55 = vcombine.high %v2954_v44, %v2946_v35  ;;  %v335_v58 = vpop.permute.xlu0 %334 }
 0x109   : > { %1461 = vrot.lane.b32.xlu0 %v500_v0, %s2596_s29  ;;  %v504_v0 = vcombine.high %v2841_v19, %v2588_v14  ;;  %v790_v44 = vrot.slane %v335_v58, %v2874_v40  ;;  %v775_v60 = vrot.slane %v2855_v26, %v2874_v40 }
 0x10a   : > { %v492_v54 = vrot.slane %v484_v62, %v2883_v45  ;;  %v437_v19 = vcombine.high %v433_v61, %v2588_v14  ;;  %v339_v62 = vpop.permute.xlu1 %338 }
 0x10b   : > { %1489 = vrot.lane.b32.xlu1 %v542_v3, %s3595_s3  ;;  %v485_v3 = vcombine.high %v452_v59, %v467_v57  ;;  %v518_v4 = vrot.slane %v504_v0, %v2874_v40  ;;  %s3598_s3 = smov 40   ;;  %v747_v57 = vrot.slane %v733_v55, %v2883_v45  ;;  %v783_v0 = vcombine.high %v335_v58, %v2588_v14 }
 0x10c   : > { %v502_v10 = vcombine.high %v492_v54, %v2588_v14  ;;  %v907_v55 = vrot.slane %v2859_v28, %v2874_v40 }
 0x10d   : > { %1469 = vrot.lane.b32.xlu0 %v501_v5, %s2598_s25  ;;  %v585_v5 = vcombine.high %v2910_v63, %v2588_v14  ;;  %v499_v6 = vrot.slane %v485_v3, %v2883_v45 }
 0x10f   : > { %1497 = vrot.lane.b32.xlu1 %v549_v7, %s3593_s7  ;;  %v550_v7 = vcombine.low %v518_v4, %v533_v2  ;;  %s3597_s7 = smov 28   ;;  %v599_v11 = vrot.slane %v585_v5, %v2874_v40 }
 0x111   : > { %1493 = vrot.lane.b32.xlu0 %v566_v9, %s3596_s8  ;;  %v570_v9 = vcombine.high %v2845_v21, %v2588_v14  ;;  %v558_v63 = vrot.slane %v550_v7, %v2883_v45  ;;  %v503_v21 = vcombine.high %v499_v6, %v2588_v14  ;;  %s3599_s8 = smov 30   ;;  %v3064_v7 = vpop.permute.xlu1 %346 }
 0x113   : > { %1521 = vrot.lane.b32.xlu1 %v608_v12, %s3590_s16  ;;  %s2614_s16 = smov 10   ;;  %v551_v12 = vcombine.high %v518_v4, %v533_v2  ;;  %v584_v13 = vrot.slane %v570_v9, %v2874_v40  ;;  %v568_v32 = vcombine.high %v558_v63, %v2588_v14  ;;  %v797_v4 = vrot.slane %v783_v0, %v2874_v40  ;;  %v343_v9 = vpop.permute.xlu0 %342 }
 0x115   : > { %1501 = vrot.lane.b32.xlu0 %v567_v15, %s3594_s20  ;;  %s2618_s20 = smov 26   ;;  %v651_v15 = vcombine.high %v2924_v8, %v2588_v14  ;;  %v565_v16 = vrot.slane %v551_v12, %v2883_v45  ;;  %v856_v12 = vrot.slane %v339_v62, %v2874_v40 }
 0x117   : > { %1529 = vrot.lane.b32.xlu1 %v615_v17, %s3583_s4  ;;  %s3586_s4 = smov 68   ;;  %v616_v17 = vcombine.low %v584_v13, %v599_v11  ;;  %v665_v36 = vrot.slane %v651_v15, %v2874_v40 }
 0x119   : > { %1525 = vrot.lane.b32.xlu0 %v632_v31, %s3592_s6  ;;  %s2616_s6 = smov 14   ;;  %v636_v31 = vcombine.high %v2851_v24, %v2588_v14  ;;  %v624_v8 = vrot.slane %v616_v17, %v2883_v45  ;;  %v569_v24 = vcombine.high %v565_v16, %v2588_v14  ;;  %v3079_v17 = vpop.permute.xlu0 %350 }
 0x11b   : > { %1553 = vrot.lane.b32.xlu1 %v674_v37, %s3584_s15  ;;  %s3587_s15 = smov 66   ;;  %v617_v37 = vcombine.high %v584_v13, %v599_v11  ;;  %v650_v41 = vrot.slane %v636_v31, %v2874_v40  ;;  %v634_v47 = vcombine.high %v624_v8, %v2588_v14  ;;  %v3073_v13 = vpop.permute.xlu1 %354 }
 0x11d   : > { %1533 = vrot.lane.b32.xlu0 %v633_v43, %s3585_s5  ;;  %s3588_s5 = smov 80   ;;  %v631_v43 = vrot.slane %v617_v37, %v2883_v45  ;;  %v682_v46 = vcombine.low %v650_v41, %v665_v36  ;;  %v834_v37 = vcombine.high %v2853_v25, %v2588_v14 }
 0x11f   : > { %1561 = vrot.lane.b32.xlu1 %v681_v48, %s3586_s4  ;;  %s3589_s4 = smov 70   ;;  %v717_v48 = vcombine.high %v2938_v18, %v2588_v14  ;;  %v690_v20 = vrot.slane %v682_v46, %v2883_v45 }
 0x121   : > { %1557 = vrot.lane.b32.xlu0 %v698_v49, %s3587_s15  ;;  %s2611_s15 = smov 8   ;;  %v683_v49 = vcombine.high %v650_v41, %v665_v36  ;;  %v731_v52 = vrot.slane %v717_v48, %v2874_v40  ;;  %v700_v23 = vcombine.high %v690_v20, %v2588_v14  ;;  %v3088_v41 = vpop.permute.xlu1 %362 }
 0x123   : > { %1585 = vrot.lane.b32.xlu1 %v740_v51, %s3588_s5  ;;  %s3591_s5 = smov 82   ;;  %v635_v51 = vcombine.high %v631_v43, %v2588_v14  ;;  %v697_v18 = vrot.slane %v683_v49, %v2883_v45  ;;  %v922_v49 = vrot.slane %v343_v9, %v2874_v40 }
 0x125   : > { %1565 = vrot.lane.b32.xlu0 %v699_v56, %s3589_s4  ;;  %s2613_s4 = smov 12   ;;  %v716_v56 = vrot.slane %v702_v50, %v2874_v40  ;;  %v701_v35 = vcombine.high %v697_v18, %v2588_v14  ;;  %v3101_v50 = vpop.permute.xlu1 %370 }
 0x127   : > { %1441 = vrot.lane.b32.xlu1 %v426_v42, %s2611_s15  ;;  %v748_v42 = vcombine.low %v716_v56, %v731_v52 }
 0x129   : > { %1589 = vrot.lane.b32.xlu0 %v764_v22, %s3591_s5  ;;  %s3600_s5 = smov 24   ;;  %v756_v59 = vrot.slane %v748_v42, %v2883_v45  ;;  %v749_v22 = vcombine.high %v716_v56, %v731_v52 }
 0x12b   : > { %1449 = vrot.lane.b32.xlu1 %v433_v61, %s2613_s4  ;;  %v765_v61 = vcombine.high %v747_v57, %v2588_v14  ;;  %v763_v2 = vrot.slane %v749_v22, %v2883_v45  ;;  %v766_v3 = vcombine.high %v756_v59, %v2588_v14 }
 0x12d   : > { %1445 = vrot.lane.b32.xlu0 %v436_v1, %s2614_s16  ;;  %v798_v1 = vcombine.low %v775_v60, %v790_v44 }
 0x12f   : > { %1473 = vrot.lane.b32.xlu1 %v492_v54, %s3600_s5  ;;  %s3607_s5 = smov 46   ;;  %v768_v54 = vcombine.high %v2855_v26, %v2588_v14  ;;  %v806_v5 = vrot.slane %v798_v1, %v2883_v45  ;;  %v767_v26 = vcombine.high %v763_v2, %v2588_v14 }
 0x131   : > { %1453 = vrot.lane.b32.xlu0 %v437_v19, %s2616_s6  ;;  %v799_v19 = vcombine.high %v775_v60, %v790_v44  ;;  %v900_v44 = vcombine.high %v2859_v28, %v2588_v14 }
 0x133   : > { %1481 = vrot.lane.b32.xlu1 %v499_v6, %s3597_s7  ;;  %s3601_s7 = smov 44   ;;  %v782_v6 = vrot.slane %v768_v54, %v2874_v40  ;;  %v914_v28 = vrot.slane %v900_v44, %v2874_v40 }
 0x135   : > { %1477 = vrot.lane.b32.xlu0 %v502_v10, %s2618_s20  ;;  %v813_v10 = vrot.slane %v799_v19, %v2883_v45  ;;  %v814_v11 = vcombine.low %v782_v6, %v797_v4  ;;  %v815_v15 = vcombine.high %v782_v6, %v797_v4 }
 0x137   : > { %1505 = vrot.lane.b32.xlu1 %v558_v63, %s3598_s3  ;;  %s3602_s3 = smov 42   ;;  %v830_v63 = vcombine.high %v806_v5, %v2588_v14  ;;  %v831_v31 = vcombine.high %v813_v10, %v2588_v14 }
 0x139   : > { %1485 = vrot.lane.b32.xlu0 %v503_v21, %s3599_s8  ;;  %s3603_s8 = smov 56   ;;  %v822_v21 = vrot.slane %v814_v11, %v2883_v45 }
 0x13b   : > { %1513 = vrot.lane.b32.xlu1 %v565_v16, %s3601_s7  ;;  %s3604_s7 = smov 60   ;;  %v841_v16 = vrot.slane %v2853_v25, %v2874_v40 }
 0x13d   : > { %1509 = vrot.lane.b32.xlu0 %v568_v32, %s3602_s3  ;;  %s3605_s3 = smov 58   ;;  %v849_v32 = vcombine.high %v339_v62, %v2588_v14  ;;  %v864_v36 = vcombine.low %v841_v16, %v856_v12  ;;  %v865_v46 = vcombine.high %v841_v16, %v856_v12  ;;  %v981_v16 = vcombine.high %v3064_v7, %v2588_v14 }
 0x13f   : > { %1537 = vrot.lane.b32.xlu1 %v624_v8, %s3603_s8  ;;  %s3606_s8 = smov 72   ;;  %v829_v8 = vrot.slane %v815_v15, %v2883_v45  ;;  %v872_v48 = vrot.slane %v864_v36, %v2883_v45 }
 0x141   : > { %1517 = vrot.lane.b32.xlu0 %v569_v24, %s3607_s5  ;;  %s3610_s5 = smov 84   ;;  %v832_v24 = vcombine.high %v822_v21, %v2588_v14  ;;  %v833_v25 = vcombine.high %v829_v8, %v2588_v14  ;;  %v896_v56 = vcombine.high %v872_v48, %v2588_v14 }
 0x143   : > { %1545 = vrot.lane.b32.xlu1 %v631_v43, %s3604_s7  ;;  %s3608_s7 = smov 62   ;;  %v863_v43 = vrot.slane %v849_v32, %v2874_v40 }
 0x145   : > { %1541 = vrot.lane.b32.xlu0 %v634_v47, %s3605_s3  ;;  %s3609_s3 = smov 76   ;;  %v3093_v47 = vpop.permute.xlu0 %358 }
 0x147   : > { %1569 = vrot.lane.b32.xlu1 %v690_v20, %s3606_s8  ;;  %s3615_s8 = smov 74   ;;  %v848_v20 = vrot.slane %v834_v37, %v2874_v40  ;;  %v966_v37 = vcombine.high %v2857_v27, %v2588_v14 }
 0x149   : > { %1549 = vrot.lane.b32.xlu0 %v635_v51, %s3608_s7  ;;  %s3611_s7 = smov 78   ;;  %v879_v51 = vrot.slane %v865_v46, %v2883_v45  ;;  %v880_v52 = vcombine.low %v848_v20, %v863_v43 }
 0x14b   : > { %1577 = vrot.lane.b32.xlu1 %v697_v18, %s3609_s3  ;;  %s3612_s3 = smov 88   ;;  %v3107_v18 = vpop.permute.xlu0 %366  ;;  %v888_v58 = vrot.slane %v880_v52, %v2883_v45  ;;  %v897_v22 = vcombine.high %v879_v51, %v2588_v14 }
 0x14d   : > { %1573 = vrot.lane.b32.xlu0 %v700_v23, %s3615_s8  ;;  %s3618_s8 = smov 100   ;;  %v915_v23 = vcombine.high %v343_v9, %v2588_v14  ;;  %v898_v54 = vcombine.high %v888_v58, %v2588_v14  ;;  %v988_v9 = vrot.slane %v3064_v7, %v2874_v40 }
 0x14f   : > { %1593 = vrot.lane.b32.xlu1 %v747_v57, %s3610_s5  ;;  %s3613_s5 = smov 86   ;;  %v930_v57 = vcombine.low %v907_v55, %v922_v49  ;;  %v929_v60 = vrot.slane %v915_v23, %v2874_v40 }
 0x151   : > { %1581 = vrot.lane.b32.xlu0 %v701_v35, %s3611_s7  ;;  %s3614_s7 = smov 92   ;;  %v881_v35 = vcombine.high %v848_v20, %v863_v43  ;;  %v3128_v1 = vrot.slane %v930_v57, %v2883_v45  ;;  %v995_v43 = vrot.slane %v981_v16, %v2874_v40  ;;  %v1054_v57 = vrot.slane %v3079_v17, %v2874_v40 }
 0x153   : > { %1601 = vrot.lane.b32.xlu1 %v756_v59, %s3612_s3  ;;  %s3616_s3 = smov 90   ;;  %v895_v0 = vrot.slane %v881_v35, %v2883_v45  ;;  %v962_v19 = vcombine.high %v3128_v1, %v2588_v14 }
 0x155   : > { %1597 = vrot.lane.b32.xlu0 %v765_v61, %s3613_s5  ;;  %s3617_s5 = smov 96   ;;  %v931_v61 = vcombine.high %v907_v55, %v922_v49 }
 0x157   : > { %1609 = vrot.lane.b32.xlu1 %v763_v2, %s3614_s7  ;;  %s2638_s7 = smov 94  }
 0x159   : > { %1605 = vrot.lane.b32.xlu0 %v766_v3, %s3616_s3  ;;  %s3619_s3 = smov 98   ;;  %v946_v3 = vcombine.low %v914_v28, %v929_v60 }
 0x15b   : > { %1617 = vrot.lane.b32.xlu1 %v806_v5, %s3617_s5  ;;  %s3620_s5 = smov 104   ;;  %v945_v5 = vrot.slane %v931_v61, %v2883_v45  ;;  %v954_v12 = vrot.slane %v946_v3, %v2883_v45  ;;  %v1047_v61 = vcombine.high %v3079_v17, %v2588_v14 }
 0x15d   : > { %1613 = vrot.lane.b32.xlu0 %v767_v26, %s2638_s7  ;;  %v899_v26 = vcombine.high %v895_v0, %v2588_v14  ;;  %v964_v36 = vcombine.high %v954_v12, %v2588_v14 }
 0x15f   : > { %1625 = vrot.lane.b32.xlu1 %v813_v10, %s3618_s8  ;;  %s3621_s8 = smov 102   ;;  %v947_v10 = vcombine.high %v914_v28, %v929_v60 }
 0x161   : > { %1621 = vrot.lane.b32.xlu0 %v830_v63, %s3619_s3  ;;  %s3622_s3 = smov 108   ;;  %v963_v63 = vcombine.high %v945_v5, %v2588_v14 }
 0x163   : > { %1633 = vrot.lane.b32.xlu1 %v822_v21, %s3620_s5  ;;  %s3623_s5 = smov 106   ;;  %v973_v21 = vrot.slane %v2857_v27, %v2874_v40 }
 0x165   : > { %1629 = vrot.lane.b32.xlu0 %v831_v31, %s3621_s8  ;;  %s3624_s8 = smov 112   ;;  %v996_v31 = vcombine.low %v973_v21, %v988_v9  ;;  %v997_v46 = vcombine.high %v973_v21, %v988_v9 }
 0x167   : > { %1641 = vrot.lane.b32.xlu1 %v829_v8, %s3622_s3  ;;  %s3625_s3 = smov 110   ;;  %v961_v8 = vrot.slane %v947_v10, %v2883_v45  ;;  %v1004_v7 = vrot.slane %v996_v31, %v2883_v45  ;;  %v1011_v49 = vrot.slane %v997_v46, %v2883_v45 }
 0x169   : > { %1637 = vrot.lane.b32.xlu0 %v832_v24, %s3623_s5  ;;  %s3626_s5 = smov 116   ;;  %v965_v20 = vcombine.high %v961_v8, %v2588_v14  ;;  %v1028_v55 = vcombine.high %v1004_v7, %v2588_v14  ;;  %v1029_v35 = vcombine.high %v1011_v49, %v2588_v14 }
 0x16b   : > { %1649 = vrot.lane.b32.xlu1 %v872_v48, %s3624_s8  ;;  %s3628_s8 = smov 114  }
 0x16d   : > { %1645 = vrot.lane.b32.xlu0 %v833_v25, %s3625_s3  ;;  %s3627_s3 = smov 120   ;;  %v980_v25 = vrot.slane %v966_v37, %v2874_v40 }
 0x16f   : > { %1657 = vrot.lane.b32.xlu1 %v879_v51, %s3626_s5  ;;  %s2650_s5 = smov 118   ;;  %v1012_v51 = vcombine.low %v980_v25, %v995_v43  ;;  %v1013_v23 = vcombine.high %v980_v25, %v995_v43  ;;  %v1120_v43 = vrot.slane %v3073_v13, %v2874_v40 }
 0x171   : > { %v3112_v42 = vpop.permute.xlu1 %1433  ;;  %1653 = vrot.lane.b32.xlu0 %v896_v56, %s3628_s8  ;;  %s2652_s8 = smov 122   ;;  %v1020_v44 = vrot.slane %v1012_v51, %v2883_v45  ;;  %v1027_v3 = vrot.slane %v1013_v23, %v2883_v45 }
 0x173   : > { %1665 = vrot.lane.b32.xlu1 %v888_v58, %s3627_s3  ;;  %v3119_v59 = vpop.permute.xlu0 %1429  ;;  %s3629_s3 = smov 124  }
 0x175   : > { %v3123_v62 = vpop.permute.xlu1 %1457  ;;  %1661 = vrot.lane.b32.xlu0 %v897_v22, %s2650_s5  ;;  %v1039_v22 = vrot.slane %v2863_v30, %v2874_v40 }
 0x177   : > { %1673 = vrot.lane.b32.xlu1 %v895_v0, %s3629_s3  ;;  %v3132_v2 = vpop.permute.xlu0 %1437  ;;  %s2653_s3 = smov 126   ;;  %v1062_v0 = vcombine.low %v1039_v22, %v1054_v57  ;;  %v1063_v9 = vcombine.high %v1039_v22, %v1054_v57  ;;  %v1098_v22 = vcombine.high %v2861_v29, %v2588_v14 }
 0x179   : > { %v3135_v4 = vpop.permute.xlu1 %1465  ;;  %1669 = vrot.lane.b32.xlu0 %v898_v54, %s2652_s8  ;;  %v1030_v54 = vcombine.high %v1020_v44, %v2588_v14  ;;  %v1070_v17 = vrot.slane %v1062_v0, %v2883_v45  ;;  %v1077_v21 = vrot.slane %v1063_v9, %v2883_v45 }
 0x17b   : > { %1681 = vrot.lane.b32.xlu1 %v962_v19, %s2592_s26  ;;  %v3142_v6 = vpop.permute.xlu0 %1461  ;;  %v1032_v19 = vcombine.high %v2863_v30, %v2588_v14  ;;  %s3687_s26 = smov 30   ;;  %v1095_v25 = vcombine.high %v1077_v21, %v2588_v14 }
 0x17d   : > { %v3147_v11 = vpop.permute.xlu1 %1489  ;;  %1677 = vrot.lane.b32.xlu0 %v899_v26, %s2653_s3  ;;  %v1061_v26 = vrot.slane %v1047_v61, %v2874_v40 }
 0x17f   : > { %1689 = vrot.lane.b32.xlu1 %v963_v63, %s2594_s27  ;;  %v3155_v15 = vpop.permute.xlu0 %1469  ;;  %v1031_v63 = vcombine.high %v1027_v3, %v2588_v14  ;;  %s3689_s27 = smov 34  }
 0x181   : > { %v3159_v32 = vpop.permute.xlu1 %1497  ;;  %1685 = vrot.lane.b32.xlu0 %v945_v5, %s2591_s21  ;;  %s3686_s21 = smov 24  }
 0x183   : > { %1697 = vrot.lane.b32.xlu1 %v964_v36, %s2614_s16  ;;  %v3167_v24 = vpop.permute.xlu0 %1493  ;;  %v1094_v36 = vcombine.high %v1070_v17, %v2588_v14  ;;  %s3693_s16 = smov 42  }
 0x185   : > { %v3171_v48 = vpop.permute.xlu1 %1521  ;;  %1693 = vrot.lane.b32.xlu0 %v954_v12, %s2611_s15  ;;  %v1046_v12 = vrot.slane %v1032_v19, %v2874_v40  ;;  %s3697_s15 = smov 50  }
 0x187   : > { %1705 = vrot.lane.b32.xlu1 %v965_v20, %s2616_s6  ;;  %v3177_v27 = vpop.permute.xlu0 %1501  ;;  %v1078_v16 = vcombine.low %v1046_v12, %v1061_v26  ;;  %v1079_v46 = vcombine.high %v1046_v12, %v1061_v26  ;;  %s3696_s6 = smov 44  }
 0x189   : > { %v3180_v52 = vpop.permute.xlu1 %1529  ;;  %1701 = vrot.lane.b32.xlu0 %v961_v8, %s2613_s4  ;;  %v1933_v8 = vsel %vm1932_vm1, %v2893_v53, %v3119_v59  ;;  %v1086_v53 = vrot.slane %v1078_v16, %v2883_v45  ;;  %s3695_s4 = smov 46  }
 0x18b   : > { %1713 = vrot.lane.b32.xlu1 %v1028_v55, %s2596_s29  ;;  %v3185_v56 = vpop.permute.xlu0 %1525  ;;  %s3691_s29 = smov 38  }
 0x18d   : > { %v3189_v58 = vpop.permute.xlu1 %1553  ;;  %1709 = vrot.lane.b32.xlu0 %v1004_v7, %s2593_s30  ;;  %s3688_s30 = smov 28   ;;  %v1935_v7 = vsel %vm1934_vm2, %v1933_v8, %v3112_v42  ;;  %v1113_v42 = vcombine.high %v3073_v13, %v2588_v14 }
 0x18e   : > { %v1937_v59 = vsel %vm1936_vm3, %v1935_v7, %v3132_v2  ;;  %v1096_v2 = vcombine.high %v1086_v53, %v2588_v14  ;;  %v1186_v7 = vrot.slane %v3093_v47, %v2874_v40 }
 0x18f   : > { %1721 = vrot.lane.b32.xlu1 %v1029_v35, %s2598_s25  ;;  %v3197_v60 = vpop.permute.xlu0 %1533  ;;  %s3692_s25 = smov 36   ;;  %v1127_v0 = vrot.slane %v1113_v42, %v2874_v40 }
 0x191   : > { %v3201_v28 = vpop.permute.xlu1 %1561  ;;  %1717 = vrot.lane.b32.xlu0 %v1011_v49, %s2595_s28  ;;  %s3690_s28 = smov 32   ;;  %v1105_v49 = vrot.slane %v2861_v29, %v2874_v40 }
 0x193   : > { %1729 = vrot.lane.b32.xlu1 %v1030_v54, %s2618_s20  ;;  %v3209_v5 = vpop.permute.xlu0 %1557  ;;  %v1128_v57 = vcombine.low %v1105_v49, %v1120_v43  ;;  %v1129_v54 = vcombine.high %v1105_v49, %v1120_v43  ;;  %s3694_s20 = smov 40  }
 0x195   : > { %v3213_v10 = vpop.permute.xlu1 %1585  ;;  %1725 = vrot.lane.b32.xlu0 %v1020_v44, %s3686_s21  ;;  %v1093_v44 = vrot.slane %v1079_v46, %v2883_v45  ;;  %v1136_v19 = vrot.slane %v1128_v57, %v2883_v45  ;;  %s3698_s21 = smov 48  }
 0x197   : > { %1737 = vrot.lane.b32.xlu1 %v1031_v63, %s3687_s26  ;;  %v3219_v30 = vpop.permute.xlu0 %1565  ;;  %v1097_v29 = vcombine.high %v1093_v44, %v2588_v14  ;;  %v1112_v63 = vrot.slane %v1098_v22, %v2874_v40  ;;  %v1160_v8 = vcombine.high %v1136_v19, %v2588_v14  ;;  %s3699_s26 = smov 54  }
 0x199   : > { %v1442_v31 = vpop.permute.xlu1 %1441  ;;  %1733 = vrot.lane.b32.xlu0 %v1027_v3, %s3688_s30  ;;  %s3700_s30 = smov 52  }
 0x19a   : > { %v1939_v51 = vsel %vm1938_vm4, %v1937_v59, %v1442_v31  ;;  %v1144_v31 = vcombine.low %v1112_v63, %v1127_v0 }
 0x19b   : > { %1745 = vrot.lane.b32.xlu1 %v1094_v36, %s3689_s27  ;;  %v3228_v37 = vpop.permute.xlu0 %1589  ;;  %s3701_s27 = smov 58  }
 0x19c   : > { %v1152_v49 = vrot.slane %v1144_v31, %v2883_v45 }
 0x19d   : > { %v1450_v20 = vpop.permute.xlu1 %1449  ;;  %1741 = vrot.lane.b32.xlu0 %v1070_v17, %s3690_s28  ;;  %s3702_s28 = smov 56  }
 0x19f   : > { %1753 = vrot.lane.b32.xlu1 %v1095_v25, %s3691_s29  ;;  %v1446_v55 = vpop.permute.xlu0 %1445  ;;  %s3703_s29 = smov 62  }
 0x1a0   : > { %v1941_v23 = vsel %vm1940_vm5, %v1939_v51, %v1446_v55  ;;  %v1171_v51 = vrot.slane %v2867_v34, %v2874_v40 }
 0x1a1   : > { %v1474_v35 = vpop.permute.xlu1 %1473  ;;  %1749 = vrot.lane.b32.xlu0 %v1077_v21, %s3692_s25  ;;  %v1943_v13 = vsel %vm1942_vm6, %v1941_v23, %v1450_v20  ;;  %v1179_v23 = vcombine.high %v3093_v47, %v2588_v14  ;;  %v1164_v47 = vcombine.high %v2867_v34, %v2588_v14  ;;  %s3704_s25 = smov 60  }
 0x1a2   : > { %v1194_v57 = vcombine.low %v1171_v51, %v1186_v7 }
 0x1a3   : > { %1761 = vrot.lane.b32.xlu1 %v1096_v2, %s3693_s16  ;;  %v1454_v61 = vpop.permute.xlu0 %1453  ;;  %s3705_s16 = smov 66  }
 0x1a4   : > { %v1945_v3 = vsel %vm1944_vm7, %v1943_v13, %v1454_v61  ;;  %v1193_v61 = vrot.slane %v1179_v23, %v2874_v40 }
 0x1a5   : > { %v1947_v26 = vsel %vm1946_vm8, %v1945_v3, %v3123_v62  ;;  %v1482_v9 = vpop.permute.xlu1 %1481  ;;  %1757 = vrot.lane.b32.xlu0 %v1086_v53, %s3694_s20  ;;  %v1143_v62 = vrot.slane %v1129_v54, %v2883_v45  ;;  %v1202_v3 = vrot.slane %v1194_v57, %v2883_v45  ;;  %s3706_s20 = smov 64  }
 0x1a6   : > { %v1949_v17 = vsel %vm1948_vm9, %v1947_v26, %v3142_v6 }
 0x1a7   : > { %1769 = vrot.lane.b32.xlu1 %v1097_v29, %s3695_s4  ;;  %v1951_v12 = vsel %vm3630_vm10, %v1949_v17, %v3135_v4  ;;  %v1478_v21 = vpop.permute.xlu0 %1477  ;;  %vm3636_vm10 = vcmask 277504   ;;  %v1161_v59 = vcombine.high %v1143_v62, %v2588_v14  ;;  %v1178_v29 = vrot.slane %v1164_v47, %v2874_v40  ;;  %s3707_s4 = smov 70  }
 0x1a8   : > { %v1953_v16 = vsel %vm3646_vm11, %v1951_v12, %v3155_v15  ;;  %v1145_v15 = vcombine.high %v1112_v63, %v1127_v0  ;;  %v1195_v0 = vcombine.high %v1171_v51, %v1186_v7  ;;  %vm3652_vm11 = vcmask 539648  }
 0x1a9   : > { %v1955_v36 = vsel %vm3631_vm12, %v1953_v16, %v1474_v35  ;;  %v1506_v6 = vpop.permute.xlu1 %1505  ;;  %1765 = vrot.lane.b32.xlu0 %v1093_v44, %s3696_s6  ;;  %vm3637_vm12 = vcmask 293888   ;;  %v1226_v16 = vcombine.high %v1202_v3, %v2588_v14  ;;  %v1237_v7 = vrot.slane %v2865_v33, %v2874_v40  ;;  %s3708_s6 = smov 68  }
 0x1aa   : > { %v1957_v43 = vsel %vm3632_vm13, %v1955_v36, %v1478_v21  ;;  %vm3638_vm13 = vcmask 310272   ;;  %v1210_v21 = vcombine.low %v1178_v29, %v1193_v61 }
 0x1ab   : > { %1777 = vrot.lane.b32.xlu1 %v1160_v8, %s3697_s15  ;;  %v1959_v4 = vsel %vm3633_vm14, %v1957_v43, %v1482_v9  ;;  %v1486_v46 = vpop.permute.xlu0 %1485  ;;  %vm3639_vm14 = vcmask 326656   ;;  %s3709_s15 = smov 74  }
 0x1ac   : > { %v1961_v20 = vsel %vm3635_vm15, %v1959_v4, %v1486_v46  ;;  %vm3641_vm15 = vcmask 359424  }
 0x1ad   : > { %v1963_v25 = vsel %vm3634_vm0, %v1961_v20, %v3147_v11  ;;  %v1514_v53 = vpop.permute.xlu1 %1513  ;;  %1773 = vrot.lane.b32.xlu0 %v1136_v19, %s3698_s21  ;;  %vm3640_vm0 = vcmask 343040   ;;  %s3710_s21 = smov 72  }
 0x1ae   : > { %v1965_v55 = vsel %vm3636_vm10, %v1963_v25, %v3167_v24  ;;  %v1162_v24 = vcombine.high %v1152_v49, %v2588_v14  ;;  %vm3642_vm10 = vcmask 375808  }
 0x1af   : > { %1785 = vrot.lane.b32.xlu1 %v1161_v59, %s3699_s26  ;;  %v1967_v11 = vsel %vm3637_vm12, %v1965_v55, %v3159_v32  ;;  %v1510_v42 = vpop.permute.xlu0 %1509  ;;  %v1159_v32 = vrot.slane %v1145_v15, %v2883_v45  ;;  %vm3643_vm12 = vcmask 392192   ;;  %v1218_v15 = vrot.slane %v1210_v21, %v2883_v45  ;;  %s3711_s26 = smov 78  }
 0x1b0   : > { %v1969_v35 = vsel %vm3638_vm13, %v1967_v11, %v3177_v27  ;;  %vm3644_vm13 = vcmask 408576   ;;  %v1230_v11 = vcombine.high %v2865_v33, %v2588_v14  ;;  %v1311_v21 = vcombine.high %v3107_v18, %v2588_v14 }
 0x1b1   : > { %v1971_v2 = vsel %vm3639_vm14, %v1969_v35, %v1506_v6  ;;  %v1538_v44 = vpop.permute.xlu1 %1537  ;;  %1781 = vrot.lane.b32.xlu0 %v1143_v62, %s3700_s30  ;;  %vm3645_vm14 = vcmask 424960   ;;  %v1163_v34 = vcombine.high %v1159_v32, %v2588_v14  ;;  %v1211_v6 = vcombine.high %v1178_v29, %v1193_v61  ;;  %s3712_s30 = smov 76  }
 0x1b2   : > { %v1973_v22 = vsel %vm3640_vm0, %v1971_v2, %v1510_v42  ;;  %vm1984_vm0 = vcmask 441344  }
 0x1b3   : > { %1793 = vrot.lane.b32.xlu1 %v1162_v24, %s3701_s27  ;;  %v1975_v27 = vsel %vm3641_vm15, %v1973_v22, %v1514_v53  ;;  %v1518_v13 = vpop.permute.xlu0 %1517  ;;  %vm3647_vm15 = vcmask 457728   ;;  %v1245_v53 = vcombine.high %v3088_v41, %v2588_v14  ;;  %s3713_s27 = smov 82  }
 0x1b4   : > { %v1977_v54 = vsel %vm3642_vm10, %v1975_v27, %v1518_v13  ;;  %vm3648_vm10 = vcmask 474112  }
 0x1b5   : > { %v1979_v19 = vsel %vm3643_vm12, %v1977_v54, %v3171_v48  ;;  %v1546_v26 = vpop.permute.xlu1 %1545  ;;  %1789 = vrot.lane.b32.xlu0 %v1152_v49, %s3702_s28  ;;  %v1209_v48 = vrot.slane %v1195_v0, %v2883_v45  ;;  %vm3649_vm12 = vcmask 490496   ;;  %v1259_v23 = vrot.slane %v1245_v53, %v2874_v40  ;;  %s3714_s28 = smov 80  }
 0x1b6   : > { %v1981_v9 = vsel %vm3644_vm13, %v1979_v19, %v3185_v56  ;;  %vm3651_vm13 = vcmask 506880  }
 0x1b7   : > { %1801 = vrot.lane.b32.xlu1 %v1163_v34, %s3703_s29  ;;  %v1983_v17 = vsel %vm3645_vm14, %v1981_v9, %v3180_v52  ;;  %v1542_v63 = vpop.permute.xlu0 %1541  ;;  %vm3650_vm14 = vcmask 523264   ;;  %v1227_v46 = vcombine.high %v1209_v48, %v2588_v14  ;;  %s3715_s29 = smov 86  }
 0x1b8   : > { %v1985_v12 = vsel %vm1984_vm0, %v1983_v17, %v3197_v60  ;;  %v1252_v60 = vrot.slane %v3088_v41, %v2874_v40 }
 0x1b9   : > { %v1987_v62 = vsel %vm3647_vm15, %v1985_v12, %v1538_v44  ;;  %v1570_v56 = vpop.permute.xlu1 %1569  ;;  %1797 = vrot.lane.b32.xlu0 %v1159_v32, %s3704_s25  ;;  %vm3653_vm15 = vcmask 556032   ;;  %v1244_v32 = vrot.slane %v1230_v11, %v2874_v40  ;;  %s3716_s25 = smov 84  }
 0x1ba   : > { %v1989_v31 = vsel %vm3648_vm10, %v1987_v62, %v1542_v63  ;;  %vm3655_vm10 = vcmask 572416   ;;  %v1260_v59 = vcombine.low %v1237_v7, %v1252_v60  ;;  %v1261_v57 = vcombine.high %v1237_v7, %v1252_v60 }
 0x1bb   : > { %1809 = vrot.lane.b32.xlu1 %v1226_v16, %s3705_s16  ;;  %v1991_v52 = vsel %vm3649_vm12, %v1989_v31, %v1546_v26  ;;  %v1550_v36 = vpop.permute.xlu0 %1549  ;;  %vm3654_vm12 = vcmask 588800   ;;  %v1276_v13 = vcombine.low %v1244_v32, %v1259_v23  ;;  %v1277_v19 = vcombine.high %v1244_v32, %v1259_v23  ;;  %s3717_s16 = smov 90  }
 0x1bc   : > { %v1993_v8 = vsel %vm3651_vm13, %v1991_v52, %v1550_v36  ;;  %vm3657_vm13 = vcmask 621568   ;;  %v1268_v2 = vrot.slane %v1260_v59, %v2883_v45  ;;  %v1275_v61 = vrot.slane %v1261_v57, %v2883_v45 }
 0x1bd   : > { %v1995_v43 = vsel %vm3650_vm14, %v1993_v8, %v3189_v58  ;;  %v1578_v4 = vpop.permute.xlu1 %1577  ;;  %1805 = vrot.lane.b32.xlu0 %v1202_v3, %s3706_s20  ;;  %vm3656_vm14 = vcmask 605184   ;;  %v1318_v26 = vrot.slane %v3107_v18, %v2874_v40  ;;  %v1284_v63 = vrot.slane %v1276_v13, %v2883_v45  ;;  %s3718_s20 = smov 88  }
 0x1be   : > { %v1997_v20 = vsel %vm3652_vm11, %v1995_v43, %v3209_v5  ;;  %v1228_v5 = vcombine.high %v1218_v15, %v2588_v14  ;;  %vm2008_vm11 = vcmask 637952   ;;  %v1292_v54 = vcombine.high %v1268_v2, %v2588_v14 }
 0x1bf   : > { %1817 = vrot.lane.b32.xlu1 %v1227_v46, %s3707_s4  ;;  %v1999_v58 = vsel %vm3653_vm15, %v1997_v20, %v3201_v28  ;;  %v1574_v25 = vpop.permute.xlu0 %1573  ;;  %v1225_v28 = vrot.slane %v1211_v6, %v2883_v45  ;;  %vm3658_vm15 = vcmask 654336   ;;  %v1293_v29 = vcombine.high %v1275_v61, %v2588_v14  ;;  %s3719_s4 = smov 92  }
 0x1c0   : > { %v2001_v49 = vsel %vm3655_vm10, %v1999_v58, %v3219_v30  ;;  %vm2014_vm10 = vcmask 687104   ;;  %v1294_v31 = vcombine.high %v1284_v63, %v2588_v14  ;;  %v1291_v36 = vrot.slane %v1277_v19, %v2883_v45 }
 0x1c1   : > { %v2003_v51 = vsel %vm3654_vm12, %v2001_v49, %v1570_v56  ;;  %v1594_v55 = vpop.permute.xlu1 %1593  ;;  %1813 = vrot.lane.b32.xlu0 %v1209_v48, %s3708_s6  ;;  %vm3659_vm12 = vcmask 670720   ;;  %v1229_v24 = vcombine.high %v1225_v28, %v2588_v14  ;;  %v1303_v48 = vrot.slane %v2871_v39, %v2874_v40  ;;  %s3720_s6 = smov 98  }
 0x1c2   : > { %v2005_v41 = vsel %vm3656_vm14, %v2003_v51, %v1574_v25  ;;  %vm3660_vm14 = vcmask 703488   ;;  %v1296_v60 = vcombine.high %v2871_v39, %v2588_v14  ;;  %v1325_v6 = vrot.slane %v1311_v21, %v2874_v40 }
 0x1c3   : > { %1825 = vrot.lane.b32.xlu1 %v1228_v5, %s3709_s15  ;;  %v2007_v30 = vsel %vm3657_vm13, %v2005_v41, %v1578_v4  ;;  %v1582_v42 = vpop.permute.xlu0 %1581  ;;  %vm3661_vm13 = vcmask 719872   ;;  %v1326_v62 = vcombine.low %v1303_v48, %v1318_v26  ;;  %v1327_v8 = vcombine.high %v1303_v48, %v1318_v26  ;;  %s3722_s15 = smov 102  }
 0x1c4   : > { %v2009_v35 = vsel %vm2008_vm11, %v2007_v30, %v1582_v42  ;;  %v1310_v39 = vrot.slane %v1296_v60, %v2874_v40  ;;  %v1384_v5 = vrot.slane %v3101_v50, %v2874_v40  ;;  %v1369_v57 = vrot.slane %v2869_v38, %v2874_v40 }
 0x1c5   : > { %v2011_v33 = vsel %vm3658_vm15, %v2009_v35, %v3213_v10  ;;  %v1602_v44 = vpop.permute.xlu1 %1601  ;;  %1821 = vrot.lane.b32.xlu0 %v1218_v15, %s3710_s21  ;;  %vm3663_vm15 = vcmask 736256   ;;  %v1334_v4 = vrot.slane %v1326_v62, %v2883_v45  ;;  %v1295_v15 = vcombine.high %v1291_v36, %v2588_v14  ;;  %s3723_s21 = smov 100  }
 0x1c6   : > { %v2013_v22 = vsel %vm3659_vm12, %v2011_v33, %v3228_v37  ;;  %vm3662_vm12 = vcmask 752640   ;;  %v1341_v58 = vrot.slane %v1327_v8, %v2883_v45  ;;  %v1342_v53 = vcombine.low %v1310_v39, %v1325_v6 }
 0x1c7   : > { %1833 = vrot.lane.b32.xlu1 %v1229_v24, %s3711_s26  ;;  %v2015_v47 = vsel %vm2014_vm10, %v2013_v22, %v1594_v55  ;;  %v1598_v27 = vpop.permute.xlu0 %1597  ;;  %v1358_v49 = vcombine.high %v1334_v4, %v2588_v14  ;;  %v1392_v33 = vcombine.low %v1369_v57, %v1384_v5  ;;  %s3724_s26 = smov 106  }
 0x1c8   : > { %v2017_v10 = vsel %vm3660_vm14, %v2015_v47, %v1598_v27  ;;  %vm3665_vm14 = vcmask 769024   ;;  %v1359_v30 = vcombine.high %v1341_v58, %v2588_v14  ;;  %v1350_v23 = vrot.slane %v1342_v53, %v2883_v45 }
 0x1c9   : > { %v1610_v0 = vpop.permute.xlu1 %1609  ;;  %1829 = vrot.lane.b32.xlu0 %v1225_v28, %s3712_s30  ;;  %v2019_v3 = vsel %vm3661_vm13, %v2017_v10, %v1602_v44  ;;  %vm3664_vm13 = vcmask 785408   ;;  %v1343_v28 = vcombine.high %v1310_v39, %v1325_v6  ;;  %v1362_v27 = vcombine.high %v2869_v38, %v2588_v14  ;;  %s3725_s30 = smov 104  }
 0x1ca   : > { %v1360_v32 = vcombine.high %v1350_v23, %v2588_v14  ;;  %v1393_v10 = vcombine.high %v1369_v57, %v1384_v5 }
 0x1cb   : > { %1841 = vrot.lane.b32.xlu1 %v1292_v54, %s3713_s27  ;;  %v1606_v37 = vpop.permute.xlu0 %1605  ;;  %v1357_v47 = vrot.slane %v1343_v28, %v2883_v45  ;;  %v1376_v38 = vrot.slane %v1362_v27, %v2874_v40  ;;  %s3726_s27 = smov 110  }
 0x1cc   : > { %v2021_v34 = vsel %vm3663_vm15, %v2019_v3, %v1606_v37  ;;  %vm3666_vm15 = vcmask 818176   ;;  %v1407_v26 = vrot.slane %v1393_v10, %v2883_v45 }
 0x1cd   : > { %v1618_v9 = vpop.permute.xlu1 %1617  ;;  %1837 = vrot.lane.b32.xlu0 %v1268_v2, %s3714_s28  ;;  %v2023_v17 = vsel %vm3662_vm12, %v2021_v34, %v1610_v0  ;;  %vm3667_vm12 = vcmask 801792   ;;  %v1377_v2 = vcombine.high %v3101_v50, %v2588_v14  ;;  %v1400_v0 = vrot.slane %v1392_v33, %v2883_v45  ;;  %s3727_s28 = smov 108  }
 0x1ce   : > { %v1361_v3 = vcombine.high %v1357_v47, %v2588_v14  ;;  %v1425_v62 = vcombine.high %v1407_v26, %v2588_v14 }
 0x1cf   : > { %1849 = vrot.lane.b32.xlu1 %v1293_v29, %s3715_s29  ;;  %v1614_v12 = vpop.permute.xlu0 %1613  ;;  %v1391_v13 = vrot.slane %v1377_v2, %v2874_v40  ;;  %s3728_s29 = smov 114  }
 0x1d0   : > { %v2025_v56 = vsel %vm3665_vm14, %v2023_v17, %v1614_v12  ;;  %vm3669_vm14 = vcmask 850944   ;;  %v1424_v17 = vcombine.high %v1400_v0, %v2588_v14 }
 0x1d1   : > { %v1626_v16 = vpop.permute.xlu1 %1625  ;;  %1845 = vrot.lane.b32.xlu0 %v1275_v61, %s3716_s25  ;;  %v2027_v52 = vsel %vm3664_vm13, %v2025_v56, %v1618_v9  ;;  %vm3668_vm13 = vcmask 834560   ;;  %v1408_v9 = vcombine.low %v1376_v38, %v1391_v13  ;;  %v1409_v48 = vcombine.high %v1376_v38, %v1391_v13  ;;  %s3729_s25 = smov 112  }
 0x1d3   : > { %1857 = vrot.lane.b32.xlu1 %v1294_v31, %s3717_s16  ;;  %v1622_v18 = vpop.permute.xlu0 %1621  ;;  %s3730_s16 = smov 116  }
 0x1d4   : > { %v2029_v43 = vsel %vm3667_vm12, %v2027_v52, %v1622_v18  ;;  %vm3670_vm12 = vcmask 883712   ;;  %v1423_v18 = vrot.slane %v1409_v48, %v2883_v45 }
 0x1d5   : > { %v1634_v46 = vpop.permute.xlu1 %1633  ;;  %1853 = vrot.lane.b32.xlu0 %v1284_v63, %s3718_s20  ;;  %v2031_v7 = vsel %vm3666_vm15, %v2029_v43, %v1626_v16  ;;  %vm3671_vm15 = vcmask 867328   ;;  %v1416_v16 = vrot.slane %v1408_v9, %v2883_v45  ;;  %s3732_s20 = smov 124  }
 0x1d7   : > { %1865 = vrot.lane.b32.xlu1 %v1295_v15, %s2638_s7  ;;  %v1630_v20 = vpop.permute.xlu0 %1629  ;;  %s3721_s7 = smov 96   ;;  %v1426_v60 = vcombine.high %v1416_v16, %v2588_v14 }
 0x1d8   : > { %v2033_v25 = vsel %vm3668_vm13, %v2031_v7, %v1630_v20  ;;  %vm3673_vm13 = vcmask 900096  }
 0x1d9   : > { %v1642_v59 = vpop.permute.xlu1 %1641  ;;  %1861 = vrot.lane.b32.xlu0 %v1291_v36, %s3719_s4  ;;  %v2035_v51 = vsel %vm3669_vm14, %v2033_v25, %v1634_v46  ;;  %vm3672_vm14 = vcmask 916480   ;;  %v1427_v46 = vcombine.high %v1423_v18, %v2588_v14 }
 0x1db   : > { %1873 = vrot.lane.b32.xlu1 %v1358_v49, %s3720_s6  ;;  %v1638_v55 = vpop.permute.xlu0 %1637 }
 0x1dc   : > { %v2037_v11 = vsel %vm3671_vm15, %v2035_v51, %v1638_v55  ;;  %vm3674_vm15 = vcmask 949248  }
 0x1dd   : > { %v1650_v41 = vpop.permute.xlu1 %1649  ;;  %1869 = vrot.lane.b32.xlu0 %v1334_v4, %s3721_s7  ;;  %v2039_v42 = vsel %vm3670_vm12, %v2037_v11, %v1642_v59  ;;  %vm3675_vm12 = vcmask 932864  }
 0x1df   : > { %1881 = vrot.lane.b32.xlu1 %v1359_v30, %s3722_s15  ;;  %v1646_v35 = vpop.permute.xlu0 %1645 }
 0x1e0   : > { %v2041_v44 = vsel %vm3673_vm13, %v2039_v42, %v1646_v35  ;;  %vm2050_vm13 = vcmask 982016  }
 0x1e1   : > { %v1658_v24 = vpop.permute.xlu1 %1657  ;;  %1877 = vrot.lane.b32.xlu0 %v1341_v58, %s3723_s21  ;;  %v2043_v22 = vsel %vm3672_vm14, %v2041_v44, %v1650_v41  ;;  %vm3676_vm14 = vcmask 965632   ;;  %s2148_s21 = scalar_lea.sflag [#allocation4], %s2818_s18 }
 0x1e3   : > { %1889 = vrot.lane.b32.xlu1 %v1360_v32, %s3724_s26  ;;  %v1654_v50 = vpop.permute.xlu0 %1653  ;;  %s2654_s26 = smov [#allocation7]  }
 0x1e4   : > { %v2045_v61 = vsel %vm3675_vm12, %v2043_v22, %v1654_v50  ;;  %vm2054_vm12 = vcmask 1014784  }
 0x1e5   : > { %v1666_v54 = vpop.permute.xlu1 %1665  ;;  %1885 = vrot.lane.b32.xlu0 %v1350_v23, %s3725_s30  ;;  %v2047_v37 = vsel %vm3674_vm15, %v2045_v61, %v1658_v24  ;;  %vm2052_vm15 = vcmask 998400   ;;  %s2500_s30 = sshll.u32 %s2654_s26, 4  ;;  %s2501_s30 = int_to_ptr.vmem [resolvable:$false] %s2500_s30 }
 0x1e7   : > { %1897 = vrot.lane.b32.xlu1 %v1361_v3, %s3726_s27  ;;  %v1662_v19 = vpop.permute.xlu0 %1661  ;;  %s2502_s27 = scalar_lea.vmem %s2501_s30, 128 }
 0x1e8   : > { %v2049_v34 = vsel %vm3676_vm14, %v2047_v37, %v1662_v19  ;;  %vm2056_vm14 = vcmask 1031168  }
 0x1e9   : > { %v1674_v29 = vpop.permute.xlu1 %1673  ;;  %1893 = vrot.lane.b32.xlu0 %v1357_v47, %s3727_s28  ;;  %v2051_v63 = vsel %vm2050_vm13, %v2049_v34, %v1666_v54 }
 0x1eb   : > { %1905 = vrot.lane.b32.xlu1 %v1424_v17, %s3728_s29  ;;  %v1670_v40 = vpop.permute.xlu0 %1669 }
 0x1ec   : > { %v2053_v12 = vsel %vm2052_vm15, %v2051_v63, %v1670_v40 }
 0x1ed   : > { %v1682_v21 = vpop.permute.xlu1 %1681  ;;  %1901 = vrot.lane.b32.xlu0 %v1400_v0, %s3729_s25  ;;  %v2055_v56 = vsel %vm2054_vm12, %v2053_v12, %v1674_v29 }
 0x1ee   : > { %v2058_v6 = vsel %vm1932_vm1, %v3128_v1, %v1682_v21  ;;  %vm3733_vm1 = vcmask 162816  }
 0x1ef   : > { %1913 = vrot.lane.b32.xlu1 %v1425_v62, %s2650_s5  ;;  %v1678_v31 = vpop.permute.xlu0 %1677  ;;  %s3731_s5 = smov 120  }
 0x1f0   : > { %v3446_v52 = vsel %vm2056_vm14, %v2055_v56, %v1678_v31 }
 0x1f1   : > { %v1690_v36 = vpop.permute.xlu1 %1689  ;;  %1909 = vrot.lane.b32.xlu0 %v1407_v26, %s3730_s16 }
 0x1f3   : > { %1921 = vrot.lane.b32.xlu1 %v1426_v60, %s2652_s8  ;;  %v1686_v8 = vpop.permute.xlu0 %1685  ;;  %s3780_s8 = sshll.u32 %s2818_s18, 2 }
 0x1f4   : > { %v2059_v43 = vsel %vm1934_vm2, %v2058_v6, %v1686_v8  ;;  %vm3734_vm2 = vcmask 179200   ;;  %s220_s4 = scalar_lea.vmem [#allocation7], %s3780_s8 }
 0x1f5   : > { %v1698_v4 = vpop.permute.xlu1 %1697  ;;  %1917 = vrot.lane.b32.xlu0 %v1416_v16, %s3731_s5  ;;  %v2060_v15 = vsel %vm1936_vm3, %v2059_v43, %v1690_v36  ;;  %vm3735_vm3 = vcmask 195584   ;;  %s2164_s6 = sshll.u32 %s220_s4, 4  ;;  %s3530_s6 = int_to_ptr.vmem [resolvable:$true] %s2164_s6 }
 0x1f6   : > { %p2503_p7 = scmp.lt.s32.totalorder %s3530_s6, %s2501_s30 }
 0x1f7   : > { %1929 = vrot.lane.b32.xlu1 %v1427_v46, %s2653_s3  ;;  %v1694_v7 = vpop.permute.xlu0 %1693  ;;  %s2300_s3 = sshll.u32 %s2574_s12, 6  ;;  %s2496_s12 = scalar_lea.vmem %s3530_s6, 64 }
 0x1f8   : > { %v2061_v45 = vsel %vm1938_vm4, %v2060_v15, %v1694_v7  ;;  %vm3736_vm4 = vcmask 211968   ;;  %s3528_s15 = scalar_lea.hbm %s3579_s2, %s2300_s3  ;;  %p2497_p8 = scmp.ne.s32.totalorder %s3530_s6, %s2496_s12 }
 0x1f9   : > { %v1706_v39 = vpop.permute.xlu1 %1705  ;;  %1925 = vrot.lane.b32.xlu0 %v1423_v18, %s3732_s20  ;;  %v2062_v1 = vsel %vm1940_vm5, %v2061_v45, %v1698_v4  ;;  %vm3737_vm5 = vcmask 228352   ;;  %p2504_p10 = scmp.lt.s32.totalorder %s2502_s27, %s2496_s12 }
 0x1fa   : > { %p2498_p11 = pnand %p2497_p8, %p3781_p0 }
 0x1fb   : > { %v1702_v20 = vpop.permute.xlu0 %1701  ;;  %p2505_p12 = por %p2504_p10, %p2503_p7 }
 0x1fc   : > { %v2063_v58 = vsel %vm1942_vm6, %v2062_v1, %v1702_v20  ;;  %vm3738_vm6 = vcmask 244736   ;;  %p2499_p4 = pneg %p2498_p11 }
 0x1fd   : > { %v1714_v25 = vpop.permute.xlu1 %1713  ;;  %v2064_v53 = vsel %vm1944_vm7, %v2063_v58, %v1706_v39  ;;  %vm3739_vm7 = vcmask 261120  }
 0x1fe   : > { %p2506_p9 = pnand %p2505_p12, %p2499_p4 }
 0x1ff   : > { %v1710_v59 = vpop.permute.xlu0 %1709 }
 0x200   : > { %v2065_v14 = vsel %vm1946_vm8, %v2064_v53, %v1710_v59  ;;  %vm3740_vm8 = vcmask 277504  }
 0x201   : > { %v1722_v49 = vpop.permute.xlu1 %1721  ;;  %v2066_v51 = vsel %vm1948_vm9, %v2065_v14, %v1714_v25  ;;  %vm3741_vm9 = vcmask 293888  }
 0x203   : > { %v1718_v55 = vpop.permute.xlu0 %1717 }
 0x204   : > { %v2067_v5 = vsel %vm3733_vm1, %v2066_v51, %v1718_v55  ;;  %vm3742_vm1 = vcmask 310272  }
 0x205   : > { %v1730_v28 = vpop.permute.xlu1 %1729  ;;  %v2068_v11 = vsel %vm3734_vm2, %v2067_v5, %v1722_v49  ;;  %vm3743_vm2 = vcmask 326656  }
 0x207   : > { %v1726_v41 = vpop.permute.xlu0 %1725 }
 0x208   : > { %v2069_v30 = vsel %vm3735_vm3, %v2068_v11, %v1726_v41  ;;  %vm3744_vm3 = vcmask 343040  }
 0x209   : > { %v1738_v42 = vpop.permute.xlu1 %1737  ;;  %v2070_v23 = vsel %vm3736_vm4, %v2069_v30, %v1730_v28  ;;  %vm3745_vm4 = vcmask 359424  }
 0x20b   : > { %v1734_v57 = vpop.permute.xlu0 %1733 }
 0x20c   : > { %v2071_v35 = vsel %vm3737_vm5, %v2070_v23, %v1734_v57  ;;  %vm3746_vm5 = vcmask 375808  }
 0x20d   : > { %v1746_v2 = vpop.permute.xlu1 %1745  ;;  %v2072_v33 = vsel %vm3738_vm6, %v2071_v35, %v1738_v42  ;;  %vm3747_vm6 = vcmask 392192  }
 0x20f   : > { %v1742_v44 = vpop.permute.xlu0 %1741 }
 0x210   : > { %v2073_v24 = vsel %vm3739_vm7, %v2072_v33, %v1742_v44  ;;  %vm3748_vm7 = vcmask 408576  }
 0x211   : > { %v1754_v32 = vpop.permute.xlu1 %1753  ;;  %v2074_v22 = vsel %vm3740_vm8, %v2073_v24, %v1746_v2  ;;  %vm3749_vm8 = vcmask 424960  }
 0x213   : > { %v1750_v47 = vpop.permute.xlu0 %1749 }
 0x214   : > { %v2075_v27 = vsel %vm3741_vm9, %v2074_v22, %v1750_v47  ;;  %vm3750_vm9 = vcmask 457728  }
 0x215   : > { %v1762_v50 = vpop.permute.xlu1 %1761  ;;  %v2076_v13 = vsel %vm3742_vm1, %v2075_v27, %v1754_v32  ;;  %vm3751_vm1 = vcmask 474112  }
 0x217   : > { %v1758_v10 = vpop.permute.xlu0 %1757 }
 0x218   : > { %v2077_v61 = vsel %vm3743_vm2, %v2076_v13, %v1758_v10  ;;  %vm3752_vm2 = vcmask 490496  }
 0x219   : > { %v1770_v0 = vpop.permute.xlu1 %1769  ;;  %v2078_v54 = vsel %vm3744_vm3, %v2077_v61, %v1762_v50  ;;  %vm3753_vm3 = vcmask 506880  }
 0x21b   : > { %v1766_v3 = vpop.permute.xlu0 %1765 }
 0x21c   : > { %v2079_v37 = vsel %vm3745_vm4, %v2078_v54, %v1766_v3  ;;  %vm3754_vm4 = vcmask 523264  }
 0x21d   : > { %v1778_v38 = vpop.permute.xlu1 %1777  ;;  %v2080_v19 = vsel %vm3746_vm5, %v2079_v37, %v1770_v0  ;;  %vm3755_vm5 = vcmask 539648  }
 0x21f   : > { %v1774_v26 = vpop.permute.xlu0 %1773 }
 0x220   : > { %v2081_v34 = vsel %vm3747_vm6, %v2080_v19, %v1774_v26  ;;  %vm3757_vm6 = vcmask 572416  }
 0x221   : > { %v1786_v9 = vpop.permute.xlu1 %1785  ;;  %v2082_v29 = vsel %vm3748_vm7, %v2081_v34, %v1778_v38  ;;  %vm3758_vm7 = vcmask 588800  }
 0x223   : > { %v1782_v17 = vpop.permute.xlu0 %1781 }
 0x224   : > { %v2083_v63 = vsel %vm3749_vm8, %v2082_v29, %v1782_v17  ;;  %vm3759_vm8 = vcmask 605184  }
 0x225   : > { %v1794_v40 = vpop.permute.xlu1 %1793  ;;  %v2084_v48 = vsel %vm1984_vm0, %v2083_v63, %v1786_v9  ;;  %vm3756_vm0 = vcmask 556032  }
 0x227   : > { %v1790_v12 = vpop.permute.xlu0 %1789 }
 0x228   : > { %v2085_v21 = vsel %vm3750_vm9, %v2084_v48, %v1790_v12  ;;  %vm3760_vm9 = vcmask 621568  }
 0x229   : > { %v1802_v62 = vpop.permute.xlu1 %1801  ;;  %v2086_v56 = vsel %vm3751_vm1, %v2085_v21, %v1794_v40  ;;  %vm3761_vm1 = vcmask 654336  }
 0x22b   : > { %v1798_v16 = vpop.permute.xlu0 %1797 }
 0x22c   : > { %v2087_v31 = vsel %vm3752_vm2, %v2086_v56, %v1798_v16  ;;  %vm3762_vm2 = vcmask 670720   ;;  %v2291_v56 = vld.sshfl [vmem:[%s2830_s19] sm:$0x33 pattern:$0x76325410] }
 0x22d   : > { %v1810_v36 = vpop.permute.xlu1 %1809  ;;  %v2088_v60 = vsel %vm3753_vm3, %v2087_v31, %v1802_v62  ;;  %vm3763_vm3 = vcmask 703488   ;;  %v2130_v16 = vcombine.high %v2291_v56, %v2291_v56 }
 0x22f   : > { %v1806_v18 = vpop.permute.xlu0 %1805 }
 0x230   : > { %v2089_v6 = vsel %vm3754_vm4, %v2088_v60, %v1806_v18  ;;  %vm3764_vm4 = vcmask 719872  }
 0x231   : > { %v1818_v8 = vpop.permute.xlu1 %1817  ;;  %v2090_v43 = vsel %vm3755_vm5, %v2089_v6, %v1810_v36  ;;  %vm3765_vm5 = vcmask 736256  }
 0x233   : > { %v1814_v4 = vpop.permute.xlu0 %1813 }
 0x234   : > { %v2091_v46 = vsel %vm3756_vm0, %v2090_v43, %v1814_v4  ;;  %vm3767_vm0 = vcmask 769024  }
 0x235   : > { %v1826_v15 = vpop.permute.xlu1 %1825  ;;  %v2092_v7 = vsel %vm3757_vm6, %v2091_v46, %v1818_v8  ;;  %vm3768_vm6 = vcmask 785408   ;;  %v2133_v8 = vmul.f32 %v2291_v56, %v3446_v52 }
 0x237   : > { %v1822_v45 = vpop.permute.xlu0 %1821 }
 0x238   : > { %v2093_v39 = vsel %vm3758_vm7, %v2092_v7, %v1822_v45  ;;  %vm3770_vm7 = vcmask 818176  }
 0x239   : > { %v1834_v1 = vpop.permute.xlu1 %1833  ;;  %v2094_v20 = vsel %vm3759_vm8, %v2093_v39, %v1826_v15  ;;  %vm3771_vm8 = vcmask 834560  }
 0x23b   : > { %v1830_v58 = vpop.permute.xlu0 %1829 }
 0x23c   : > { %v2095_v25 = vsel %vm3760_vm9, %v2094_v20, %v1830_v58  ;;  %vm3772_vm9 = vcmask 850944  }
 0x23d   : > { %v1842_v53 = vpop.permute.xlu1 %1841  ;;  %v2096_v59 = vsel %vm2008_vm11, %v2095_v25, %v1834_v1  ;;  %vm3766_vm11 = vcmask 752640  }
 0x23f   : > { %v1838_v14 = vpop.permute.xlu0 %1837 }
 0x240   : > { %v2097_v49 = vsel %vm3761_vm1, %v2096_v59, %v1838_v14  ;;  %vm3773_vm1 = vcmask 867328  }
 0x241   : > { %v1850_v51 = vpop.permute.xlu1 %1849  ;;  %v2098_v55 = vsel %vm3762_vm2, %v2097_v49, %v1842_v53  ;;  %vm3774_vm2 = vcmask 883712  }
 0x243   : > { %v1846_v5 = vpop.permute.xlu0 %1845 }
 0x244   : > { %v2099_v28 = vsel %vm2014_vm10, %v2098_v55, %v1846_v5  ;;  %vm3769_vm10 = vcmask 801792  }
 0x245   : > { %v1858_v11 = vpop.permute.xlu1 %1857  ;;  %v2100_v41 = vsel %vm3763_vm3, %v2099_v28, %v1850_v51  ;;  %vm3775_vm3 = vcmask 900096  }
 0x247   : > { %v1854_v30 = vpop.permute.xlu0 %1853 }
 0x248   : > { %v2101_v42 = vsel %vm3764_vm4, %v2100_v41, %v1854_v30  ;;  %vm3776_vm4 = vcmask 916480  }
 0x249   : > { %v1866_v23 = vpop.permute.xlu1 %1865  ;;  %v2102_v57 = vsel %vm3765_vm5, %v2101_v42, %v1858_v11  ;;  %vm3777_vm5 = vcmask 932864  }
 0x24b   : > { %v1862_v35 = vpop.permute.xlu0 %1861 }
 0x24c   : > { %v2103_v2 = vsel %vm3766_vm11, %v2102_v57, %v1862_v35  ;;  %vm3778_vm11 = vcmask 949248  }
 0x24d   : > { %v1874_v33 = vpop.permute.xlu1 %1873  ;;  %v2104_v44 = vsel %vm3767_vm0, %v2103_v2, %v1866_v23  ;;  %vm3779_vm0 = vcmask 965632  }
 0x24f   : > { %v1870_v24 = vpop.permute.xlu0 %1869 }
 0x250   : > { %v2105_v32 = vsel %vm3768_vm6, %v2104_v44, %v1870_v24 }
 0x251   : > { %v1882_v22 = vpop.permute.xlu1 %1881  ;;  %v2106_v47 = vsel %vm3769_vm10, %v2105_v32, %v1874_v33 }
 0x253   : > { %v1878_v27 = vpop.permute.xlu0 %1877 }
 0x254   : > { %v2107_v50 = vsel %vm3770_vm7, %v2106_v47, %v1878_v27 }
 0x255   : > { %v1890_v13 = vpop.permute.xlu1 %1889  ;;  %v2108_v10 = vsel %vm3771_vm8, %v2107_v50, %v1882_v22 }
 0x257   : > { %v1886_v61 = vpop.permute.xlu0 %1885 }
 0x258   : > { %v2109_v0 = vsel %vm3772_vm9, %v2108_v10, %v1886_v61 }
 0x259   : > { %v1898_v54 = vpop.permute.xlu1 %1897  ;;  %v2110_v3 = vsel %vm3773_vm1, %v2109_v0, %v1890_v13 }
 0x25b   : > { %v1894_v37 = vpop.permute.xlu0 %1893 }
 0x25c   : > { %v2111_v38 = vsel %vm3774_vm2, %v2110_v3, %v1894_v37 }
 0x25d   : > { %v1906_v19 = vpop.permute.xlu1 %1905  ;;  %v2112_v26 = vsel %vm3775_vm3, %v2111_v38, %v1898_v54 }
 0x25f   : > { %v1902_v34 = vpop.permute.xlu0 %1901 }
 0x260   : > { %v2113_v9 = vsel %vm3776_vm4, %v2112_v26, %v1902_v34 }
 0x261   : > { %v1914_v29 = vpop.permute.xlu1 %1913  ;;  %v2114_v17 = vsel %vm3777_vm5, %v2113_v9, %v1906_v19 }
 0x263   : > { %v1910_v63 = vpop.permute.xlu0 %1909 }
 0x264   : > { %v2115_v40 = vsel %vm3778_vm11, %v2114_v17, %v1910_v63 }
 0x265   : > { %v1922_v48 = vpop.permute.xlu1 %1921  ;;  %v2116_v12 = vsel %vm3779_vm0, %v2115_v40, %v1914_v29 }
 0x267   : > { %v1918_v21 = vpop.permute.xlu0 %1917 }
 0x268   : > { %v2117_v62 = vsel %vm2050_vm13, %v2116_v12, %v1918_v21 }
 0x269   : > { %v2118_v31 = vsel %vm2052_vm15, %v2117_v62, %v1922_v48  ;;  %v1930_v60 = vpop.permute.xlu1 %1929 }
 0x26b   : > { %v1926_v36 = vpop.permute.xlu0 %1925 }
 0x26c   : > { %v2119_v18 = vsel %vm2054_vm12, %v2118_v31, %v1926_v36 }
 0x26d   : > { %v2120_v6 = vsel %vm2056_vm14, %v2119_v18, %v1930_v60 }
 0x26e   : > { %v2134_v43 = vmul.f32 %v2130_v16, %v2120_v6 }
 0x270   : > { %v2137_v4 = vcombine.low %v2133_v8, %v2134_v43 }
 0x272   : > { %2292 = vst.sshfl [vmem:[%s220_s4] sm:$0x33 pattern:$0x76325410] %v2137_v4 }
 0x273   : > { %2509 = shalt.err (!%p2506_p9)
}
 0x274   : > { %s2510_s18 = scalar_lea.hbm %s3528_s15, 64  ;;  %s2514_s25 = scalar_lea.hbm %s3579_s2, 128 }
 0x275   : > { %p2511_p1 = scmp.ne.s32.totalorder %s3528_s15, %s2510_s18  ;;  %p2515_p5 = scmp.lt.u32.totalorder %s3528_s15, %s3579_s2 }
 0x276   : > { %p2516_p13 = scmp.lt.u32.totalorder %s2514_s25, %s2510_s18  ;;  %p2518_p8 = scmp.lt.u32.totalorder %s2510_s18, %s3528_s15 }
 0x277   : > { %p2512_p6 = pnand %p2511_p1, %p3781_p0 }
 0x278   : > { %p2517_p3 = por %p2516_p13, %p2515_p5 }
 0x279   : > { %p2513_p2 = pneg %p2512_p6 }
 0x27a   : > { %p2519_p11 = por %p2518_p8, %p2517_p3 }
 0x27c   : > { %p2520_p4 = pnand %p2519_p11, %p2513_p2 }
 0x27e   : > { %2523 = shalt.err (!%p2520_p4)
}
 0x27f   : > { %2305 = dma.vmem_to_hbm [thread:$0]  (%p3781_p0), %s3530_s6, 64, %s3528_s15, %s2148_s21  }
 0x280 PF: > { %s2176_s20 = sand.u32 1, %s2562_s9   ;;  %p3782_p7 = scmp.ne.s32.totalorder %s3680_s24, 0 }
 0x281   : > { %p3783_p10 = scmp.ge.s32.totalorder %s2582_s14, 2  ;;  %s2177_s3 = scalar_lea.sflag [#allocation4], %s2176_s20 }
 0x283   : > { %p2315_p12 = pnand %p3783_p10, %p3782_p7 }
 0x285   : > { %2557 = dma.done.wait (!%p2315_p12), %s2177_s3, 64  }
 0x286   : > { %2559 = vsyncadd (!%p2315_p12), %s2177_s3, 4294967232  ;;  %s21_s14 = sadd.s32 1, %s2582_s14   ;;  %s3784_s9 = smov %s2566_s10 }
 0x287   : > { %p18_p9 = scmp.ge.s32.totalorder %s21_s14, 4   ;;  %s3785_s10 = smov %s2570_s11 }
 0x288   : > { %s3786_s11 = smov %s2726_s23  ;;  %s3787_s12 = smov %s2578_s13 }
 0x289   : > { %s3788_s13 = smov %s3790_s17  ;;  %20 = sbr.rel (!%p18_p9) target bundleno = 8 (0x8), region = 89 }
 0x290   :  { %2182 = vsyncpa [#allocation3], 1 }
 0x291   :  { %2184 = vsyncpa [#allocation3 + $0x1], 1 }
 0x292   :  { %2185 = vsyncpa [#allocation6], 1 }
 0x293   :  { %2187 = vsyncpa [#allocation6 + $0x1], 1 }
 0x294   :  { %2188 = vsyncpa [#allocation4], 1 }
 0x295   :  { %2190 = vsyncpa [#allocation4 + $0x1], 1 }

</bundles_post_ra>
